<compile_context>
chip_gen: v7x
topology: tpu7x:2x2x1
jax: 0.10.0
libtpu: 0.0.40
codegen_flags: <defaults>
</compile_context>

<pallas_src>
import functools

import jax
import jax.numpy as jnp
from jax.experimental import pallas as pl
from jax.experimental.pallas import tpu as pltpu


def _sigmoid(v):
    # Shared by kernel and reference so both use identical numerics.
    return 1.0 / (1.0 + jnp.exp(-v))


def _round_up(n, m):
    return -(-n // m) * m


def _orthogonal(key, shape, gain=1.0):
    """Mimics torch.nn.init.orthogonal_ (QR of a Gaussian, sign-fixed)."""
    rows, cols = shape
    a = jax.random.normal(key, (max(rows, cols), min(rows, cols)), dtype=jnp.float32)
    q, r = jnp.linalg.qr(a)
    q = q * jnp.where(jnp.diagonal(r) < 0.0, -1.0, 1.0)
    if rows < cols:
        q = q.T
    return (gain * q[:rows, :cols]).astype(jnp.float32)


def init_params(key, input_size, lstm_hidden, num_layers):
    """PyTorch-layout LSTM parameters.

    w_ih_l{k}: (4H, d_k), w_hh_l{k}: (4H, H), b_*_l{k}: (4H,); gate order i,f,g,o.
    Layer-0 weights get orthogonal(gain=1.4) init like the module's __init__
    (initialization only — it does not change the forward semantics).
    """
    H = lstm_hidden
    bound = 1.0 / float(H) ** 0.5
    params = {}
    keys = jax.random.split(key, 4 * num_layers)
    for l in range(num_layers):
        d = input_size if l == 0 else H
        k0, k1, k2, k3 = keys[4 * l:4 * l + 4]
        if l == 0:
            w_ih = _orthogonal(k0, (4 * H, d), gain=1.4)
            w_hh = _orthogonal(k1, (4 * H, H), gain=1.4)
        else:
            w_ih = jax.random.uniform(k0, (4 * H, d), minval=-bound, maxval=bound,
                                      dtype=jnp.float32)
            w_hh = jax.random.uniform(k1, (4 * H, H), minval=-bound, maxval=bound,
                                      dtype=jnp.float32)
        params[f"w_ih_l{l}"] = w_ih
        params[f"w_hh_l{l}"] = w_hh
        params[f"b_ih_l{l}"] = jax.random.uniform(k2, (4 * H,), minval=-bound,
                                                  maxval=bound, dtype=jnp.float32)
        params[f"b_hh_l{l}"] = jax.random.uniform(k3, (4 * H,), minval=-bound,
                                                  maxval=bound, dtype=jnp.float32)
    return params


def _layer_mats(params, l):
    """Fused per-layer operands. Mathematically identical to PyTorch:

    gates = x_t @ W_ih^T + b_ih + h_{t-1} @ W_hh^T + b_hh
          = [x_t, h_{t-1}] @ [W_ih^T ; W_hh^T] + (b_ih + b_hh)
    """
    wcat = jnp.concatenate([params[f"w_ih_l{l}"].T, params[f"w_hh_l{l}"].T], axis=0)
    bcat = (params[f"b_ih_l{l}"] + params[f"b_hh_l{l}"])[None, :]
    return wcat.astype(jnp.float32), bcat.astype(jnp.float32)


def pack_params(params, input_size, lstm_hidden, num_layers):
    """Pack all layers' fused weights+bias into ONE f32 blob (one input DMA).

    Each layer section = [W_cat (d+H rows) ; b_cat (1 row)], zero-padded to a
    multiple of 8 rows so every in-kernel static slice starts sublane-aligned.
    """
    H = lstm_hidden
    sections, offsets, off = [], [], 0
    for l in range(num_layers):
        d = input_size if l == 0 else H
        W, b = _layer_mats(params, l)
        sec = jnp.concatenate([W, b], axis=0)                  # (d+H+1, 4H)
        nrows = _round_up(d + H + 1, 8)
        sec = jnp.pad(sec, ((0, nrows - (d + H + 1)), (0, 0)))
        sections.append(sec)
        offsets.append(off)
        off += nrows
    return jnp.concatenate(sections, axis=0), tuple(offsets)


def decoder_lstm_kernel(x_ref, p_ref, out_ref, *,
                        input_size, lstm_hidden, num_layers, seq_len, batch,
                        layer_offsets):
    H = lstm_hidden
    x = x_ref[...]                                             # (B, T, D_in) f32

    # Static 8-aligned slices of the packed blob: read once, reused all steps.
    Ws, bs = [], []
    for l in range(num_layers):
        d = input_size if l == 0 else H
        off = layer_offsets[l]
        Ws.append(p_ref[off:off + d + H, :])                   # (d+H, 4H)
        bs.append(p_ref[off + d + H:off + d + H + 1, :])       # (1, 4H)

    # h0 / c0 = zeros, exactly like the PyTorch forward.
    hs = [jnp.zeros((batch, H), jnp.float32) for _ in range(num_layers)]
    cs = [jnp.zeros((batch, H), jnp.float32) for _ in range(num_layers)]

    outs = []
    for t in range(seq_len):        # tiny static trip counts -> fully unrolled
        inp = x[:, t, :]
        for l in range(num_layers):
            z = jnp.concatenate([inp, hs[l]], axis=1)          # (B, d+H)
            gates = jnp.dot(z, Ws[l], preferred_element_type=jnp.float32) + bs[l]
            i = _sigmoid(gates[:, 0:H])
            f = _sigmoid(gates[:, H:2 * H])
            g = jnp.tanh(gates[:, 2 * H:3 * H])
            o = _sigmoid(gates[:, 3 * H:4 * H])
            cs[l] = f * cs[l] + i * g
            hs[l] = o * jnp.tanh(cs[l])
            inp = hs[l]
            # TODO(synk): nn.LSTM inter-layer dropout(p=0.2) is train-only;
            # inference (eval) semantics -> identity, nothing to apply here.
        outs.append(hs[-1])

    # Single lane-dense store (B, T*H); wrapper reshapes to (B, T, H).
    out_ref[...] = jnp.concatenate(outs, axis=1)


def decoder_forward(x, params, *, input_size, lstm_hidden, num_layers):
    """Pallas forward of _Decoder: out, _ = LSTM(x, (zeros, zeros)); return out."""
    B, T, D = x.shape
    assert D == input_size
    blob, offsets = pack_params(params, input_size, lstm_hidden, num_layers)
    kernel = functools.partial(
        decoder_lstm_kernel,
        input_size=input_size, lstm_hidden=lstm_hidden, num_layers=num_layers,
        seq_len=T, batch=B, layer_offsets=offsets)
    vmem = pl.BlockSpec(memory_space=pltpu.MemorySpace.VMEM)
    out2d = pl.pallas_call(
        kernel,
        out_shape=jax.ShapeDtypeStruct((B, T * lstm_hidden), jnp.float32),
        in_specs=[vmem, vmem],          # only 2 inputs: x + packed params blob
        out_specs=vmem,
    )(x.astype(jnp.float32), blob)
    return out2d.reshape(B, T, lstm_hidden)


def decoder_reference(x, params, *, lstm_hidden, num_layers):
    """Pure-JAX reference implementing the PyTorch LSTM equations."""
    B, T, _ = x.shape
    H = lstm_hidden
    mats = [_layer_mats(params, l) for l in range(num_layers)]
    hs = [jnp.zeros((B, H), jnp.float32) for _ in range(num_layers)]
    cs = [jnp.zeros((B, H), jnp.float32) for _ in range(num_layers)]
    outs = []
    for t in range(T):
        inp = x[:, t, :].astype(jnp.float32)
        for l in range(num_layers):
            W, b = mats[l]
            gates = jnp.concatenate([inp, hs[l]], axis=1) @ W + b
            i = _sigmoid(gates[:, 0:H])
            f = _sigmoid(gates[:, H:2 * H])
            g = jnp.tanh(gates[:, 2 * H:3 * H])
            o = _sigmoid(gates[:, 3 * H:4 * H])
            cs[l] = f * cs[l] + i * g
            hs[l] = o * jnp.tanh(cs[l])
            inp = hs[l]
        outs.append(hs[-1])
    return jnp.stack(outs, axis=1)


if __name__ == "__main__":
    key = jax.random.PRNGKey(0)
    k_x, k_p = jax.random.split(key)

    # _Decoder(hidden_size=32, output_size=16, num_layers=2); x: (B, T, hidden_size)
    B, T = 2, 8
    HIDDEN_SIZE = 32     # LSTM input feature size (module's `hidden_size`)
    OUTPUT_SIZE = 16     # LSTM hidden/output size (module's `output_size`)
    NUM_LAYERS = 2

    x = jax.random.normal(k_x, (B, T, HIDDEN_SIZE), dtype=jnp.float32)
    params = init_params(k_p, HIDDEN_SIZE, OUTPUT_SIZE, NUM_LAYERS)

    out = decoder_forward(x, params, input_size=HIDDEN_SIZE,
                          lstm_hidden=OUTPUT_SIZE, num_layers=NUM_LAYERS)
    out = jax.block_until_ready(out)

    ref = decoder_reference(x, params, lstm_hidden=OUTPUT_SIZE,
                            num_layers=NUM_LAYERS)
    assert out.shape == (B, T, OUTPUT_SIZE)
    assert jnp.allclose(out, ref, atol=1e-4, rtol=1e-4), "mismatch vs reference"
    print("KERNEL_OK")
</pallas_src>

<mosaic_0001>
module attributes {stable_mosaic.version = 11 : i64} {
  func.func @decoder_lstm_kernel(%arg0: memref<2x8x32xf32, #tpu.memory_space<vmem>>, %arg1: memref<96x64xf32, #tpu.memory_space<vmem>>, %arg2: memref<2x128xf32, #tpu.memory_space<vmem>>) attributes {dimension_semantics = [], scalar_prefetch = 0 : i64, scratch_operands = 0 : i64, tpu.core_type = #tpu.core_type<tc>} {
    %c0 = arith.constant 0 : index
    %c0_0 = arith.constant 0 : index
    %c0_1 = arith.constant 0 : index
    %0 = vector.load %arg0[%c0, %c0_0, %c0_1] : memref<2x8x32xf32, #tpu.memory_space<vmem>>, vector<2x8x32xf32>
    %c0_2 = arith.constant 0 : index
    %c0_3 = arith.constant 0 : index
    %1 = vector.load %arg1[%c0_2, %c0_3] : memref<96x64xf32, #tpu.memory_space<vmem>>, vector<48x64xf32>
    %c48 = arith.constant 48 : index
    %c0_4 = arith.constant 0 : index
    %2 = vector.load %arg1[%c48, %c0_4] : memref<96x64xf32, #tpu.memory_space<vmem>>, vector<1x64xf32>
    %c56 = arith.constant 56 : index
    %c0_5 = arith.constant 0 : index
    %3 = vector.load %arg1[%c56, %c0_5] : memref<96x64xf32, #tpu.memory_space<vmem>>, vector<32x64xf32>
    %c88 = arith.constant 88 : index
    %c0_6 = arith.constant 0 : index
    %4 = vector.load %arg1[%c88, %c0_6] : memref<96x64xf32, #tpu.memory_space<vmem>>, vector<1x64xf32>
    %cst = arith.constant 0.000000e+00 : f32
    %5 = vector.broadcast %cst : f32 to vector<2x16xf32>
    %cst_7 = arith.constant 0.000000e+00 : f32
    %6 = vector.broadcast %cst_7 : f32 to vector<2x16xf32>
    %cst_8 = arith.constant 0.000000e+00 : f32
    %7 = vector.broadcast %cst_8 : f32 to vector<2x16xf32>
    %cst_9 = arith.constant 0.000000e+00 : f32
    %8 = vector.broadcast %cst_9 : f32 to vector<2x16xf32>
    %9 = vector.extract_strided_slice %0 {offsets = [0, 0, 0], sizes = [2, 1, 32], strides = [1, 1, 1]} : vector<2x8x32xf32> to vector<2x1x32xf32>
    %10 = vector.shape_cast %9 : vector<2x1x32xf32> to vector<2x32xf32>
    %11 = tpu.concatenate %10, %5 in 1 : vector<2x32xf32>, vector<2x16xf32> -> vector<2x48xf32>
    %cst_10 = arith.constant dense<0.000000e+00> : vector<2x64xf32>
    %12 = tpu.matmul %11, %1, %cst_10 {dimension_numbers = #tpu.dot_dimension_numbers<[1], [0], [0], [1], [0, 0, 1, 1], [], []>} : vector<2x48xf32>, vector<48x64xf32>, vector<2x64xf32> -> vector<2x64xf32>
    %13 = vector.broadcast %2 : vector<1x64xf32> to vector<2x64xf32>
    %14 = arith.addf %12, %13 : vector<2x64xf32>
    %15 = vector.extract_strided_slice %14 {offsets = [0, 0], sizes = [2, 16], strides = [1, 1]} : vector<2x64xf32> to vector<2x16xf32>
    %cst_11 = arith.constant 0.000000e+00 : f32
    %16 = vector.broadcast %cst_11 : f32 to vector<2x16xf32>
    %17 = arith.subf %16, %15 : vector<2x16xf32>
    %18 = math.exp %17 : vector<2x16xf32>
    %cst_12 = arith.constant 1.000000e+00 : f32
    %19 = vector.broadcast %cst_12 : f32 to vector<2x16xf32>
    %20 = arith.addf %19, %18 : vector<2x16xf32>
    %cst_13 = arith.constant 1.000000e+00 : f32
    %21 = vector.broadcast %cst_13 : f32 to vector<2x16xf32>
    %22 = arith.divf %21, %20 : vector<2x16xf32>
    %23 = vector.extract_strided_slice %14 {offsets = [0, 16], sizes = [2, 16], strides = [1, 1]} : vector<2x64xf32> to vector<2x16xf32>
    %cst_14 = arith.constant 0.000000e+00 : f32
    %24 = vector.broadcast %cst_14 : f32 to vector<2x16xf32>
    %25 = arith.subf %24, %23 : vector<2x16xf32>
    %26 = math.exp %25 : vector<2x16xf32>
    %cst_15 = arith.constant 1.000000e+00 : f32
    %27 = vector.broadcast %cst_15 : f32 to vector<2x16xf32>
    %28 = arith.addf %27, %26 : vector<2x16xf32>
    %cst_16 = arith.constant 1.000000e+00 : f32
    %29 = vector.broadcast %cst_16 : f32 to vector<2x16xf32>
    %30 = arith.divf %29, %28 : vector<2x16xf32>
    %31 = vector.extract_strided_slice %14 {offsets = [0, 32], sizes = [2, 16], strides = [1, 1]} : vector<2x64xf32> to vector<2x16xf32>
    %32 = math.tanh %31 : vector<2x16xf32>
    %33 = vector.extract_strided_slice %14 {offsets = [0, 48], sizes = [2, 16], strides = [1, 1]} : vector<2x64xf32> to vector<2x16xf32>
    %cst_17 = arith.constant 0.000000e+00 : f32
    %34 = vector.broadcast %cst_17 : f32 to vector<2x16xf32>
    %35 = arith.subf %34, %33 : vector<2x16xf32>
    %36 = math.exp %35 : vector<2x16xf32>
    %cst_18 = arith.constant 1.000000e+00 : f32
    %37 = vector.broadcast %cst_18 : f32 to vector<2x16xf32>
    %38 = arith.addf %37, %36 : vector<2x16xf32>
    %cst_19 = arith.constant 1.000000e+00 : f32
    %39 = vector.broadcast %cst_19 : f32 to vector<2x16xf32>
    %40 = arith.divf %39, %38 : vector<2x16xf32>
    %41 = arith.mulf %30, %7 : vector<2x16xf32>
    %42 = arith.mulf %22, %32 : vector<2x16xf32>
    %43 = arith.addf %41, %42 : vector<2x16xf32>
    %44 = math.tanh %43 : vector<2x16xf32>
    %45 = arith.mulf %40, %44 : vector<2x16xf32>
    %46 = tpu.concatenate %45, %6 in 1 : vector<2x16xf32>, vector<2x16xf32> -> vector<2x32xf32>
    %cst_20 = arith.constant dense<0.000000e+00> : vector<2x64xf32>
    %47 = tpu.matmul %46, %3, %cst_20 {dimension_numbers = #tpu.dot_dimension_numbers<[1], [0], [0], [1], [0, 0, 1, 1], [], []>} : vector<2x32xf32>, vector<32x64xf32>, vector<2x64xf32> -> vector<2x64xf32>
    %48 = vector.broadcast %4 : vector<1x64xf32> to vector<2x64xf32>
    %49 = arith.addf %47, %48 : vector<2x64xf32>
    %50 = vector.extract_strided_slice %49 {offsets = [0, 0], sizes = [2, 16], strides = [1, 1]} : vector<2x64xf32> to vector<2x16xf32>
    %cst_21 = arith.constant 0.000000e+00 : f32
    %51 = vector.broadcast %cst_21 : f32 to vector<2x16xf32>
    %52 = arith.subf %51, %50 : vector<2x16xf32>
    %53 = math.exp %52 : vector<2x16xf32>
    %cst_22 = arith.constant 1.000000e+00 : f32
    %54 = vector.broadcast %cst_22 : f32 to vector<2x16xf32>
    %55 = arith.addf %54, %53 : vector<2x16xf32>
    %cst_23 = arith.constant 1.000000e+00 : f32
    %56 = vector.broadcast %cst_23 : f32 to vector<2x16xf32>
    %57 = arith.divf %56, %55 : vector<2x16xf32>
    %58 = vector.extract_strided_slice %49 {offsets = [0, 16], sizes = [2, 16], strides = [1, 1]} : vector<2x64xf32> to vector<2x16xf32>
    %cst_24 = arith.constant 0.000000e+00 : f32
    %59 = vector.broadcast %cst_24 : f32 to vector<2x16xf32>
    %60 = arith.subf %59, %58 : vector<2x16xf32>
    %61 = math.exp %60 : vector<2x16xf32>
    %cst_25 = arith.constant 1.000000e+00 : f32
    %62 = vector.broadcast %cst_25 : f32 to vector<2x16xf32>
    %63 = arith.addf %62, %61 : vector<2x16xf32>
    %cst_26 = arith.constant 1.000000e+00 : f32
    %64 = vector.broadcast %cst_26 : f32 to vector<2x16xf32>
    %65 = arith.divf %64, %63 : vector<2x16xf32>
    %66 = vector.extract_strided_slice %49 {offsets = [0, 32], sizes = [2, 16], strides = [1, 1]} : vector<2x64xf32> to vector<2x16xf32>
    %67 = math.tanh %66 : vector<2x16xf32>
    %68 = vector.extract_strided_slice %49 {offsets = [0, 48], sizes = [2, 16], strides = [1, 1]} : vector<2x64xf32> to vector<2x16xf32>
    %cst_27 = arith.constant 0.000000e+00 : f32
    %69 = vector.broadcast %cst_27 : f32 to vector<2x16xf32>
    %70 = arith.subf %69, %68 : vector<2x16xf32>
    %71 = math.exp %70 : vector<2x16xf32>
    %cst_28 = arith.constant 1.000000e+00 : f32
    %72 = vector.broadcast %cst_28 : f32 to vector<2x16xf32>
    %73 = arith.addf %72, %71 : vector<2x16xf32>
    %cst_29 = arith.constant 1.000000e+00 : f32
    %74 = vector.broadcast %cst_29 : f32 to vector<2x16xf32>
    %75 = arith.divf %74, %73 : vector<2x16xf32>
    %76 = arith.mulf %65, %8 : vector<2x16xf32>
    %77 = arith.mulf %57, %67 : vector<2x16xf32>
    %78 = arith.addf %76, %77 : vector<2x16xf32>
    %79 = math.tanh %78 : vector<2x16xf32>
    %80 = arith.mulf %75, %79 : vector<2x16xf32>
    %81 = vector.extract_strided_slice %0 {offsets = [0, 1, 0], sizes = [2, 1, 32], strides = [1, 1, 1]} : vector<2x8x32xf32> to vector<2x1x32xf32>
    %82 = vector.shape_cast %81 : vector<2x1x32xf32> to vector<2x32xf32>
    %83 = tpu.concatenate %82, %45 in 1 : vector<2x32xf32>, vector<2x16xf32> -> vector<2x48xf32>
    %cst_30 = arith.constant dense<0.000000e+00> : vector<2x64xf32>
    %84 = tpu.matmul %83, %1, %cst_30 {dimension_numbers = #tpu.dot_dimension_numbers<[1], [0], [0], [1], [0, 0, 1, 1], [], []>} : vector<2x48xf32>, vector<48x64xf32>, vector<2x64xf32> -> vector<2x64xf32>
    %85 = vector.broadcast %2 : vector<1x64xf32> to vector<2x64xf32>
    %86 = arith.addf %84, %85 : vector<2x64xf32>
    %87 = vector.extract_strided_slice %86 {offsets = [0, 0], sizes = [2, 16], strides = [1, 1]} : vector<2x64xf32> to vector<2x16xf32>
    %cst_31 = arith.constant 0.000000e+00 : f32
    %88 = vector.broadcast %cst_31 : f32 to vector<2x16xf32>
    %89 = arith.subf %88, %87 : vector<2x16xf32>
    %90 = math.exp %89 : vector<2x16xf32>
    %cst_32 = arith.constant 1.000000e+00 : f32
    %91 = vector.broadcast %cst_32 : f32 to vector<2x16xf32>
    %92 = arith.addf %91, %90 : vector<2x16xf32>
    %cst_33 = arith.constant 1.000000e+00 : f32
    %93 = vector.broadcast %cst_33 : f32 to vector<2x16xf32>
    %94 = arith.divf %93, %92 : vector<2x16xf32>
    %95 = vector.extract_strided_slice %86 {offsets = [0, 16], sizes = [2, 16], strides = [1, 1]} : vector<2x64xf32> to vector<2x16xf32>
    %cst_34 = arith.constant 0.000000e+00 : f32
    %96 = vector.broadcast %cst_34 : f32 to vector<2x16xf32>
    %97 = arith.subf %96, %95 : vector<2x16xf32>
    %98 = math.exp %97 : vector<2x16xf32>
    %cst_35 = arith.constant 1.000000e+00 : f32
    %99 = vector.broadcast %cst_35 : f32 to vector<2x16xf32>
    %100 = arith.addf %99, %98 : vector<2x16xf32>
    %cst_36 = arith.constant 1.000000e+00 : f32
    %101 = vector.broadcast %cst_36 : f32 to vector<2x16xf32>
    %102 = arith.divf %101, %100 : vector<2x16xf32>
    %103 = vector.extract_strided_slice %86 {offsets = [0, 32], sizes = [2, 16], strides = [1, 1]} : vector<2x64xf32> to vector<2x16xf32>
    %104 = math.tanh %103 : vector<2x16xf32>
    %105 = vector.extract_strided_slice %86 {offsets = [0, 48], sizes = [2, 16], strides = [1, 1]} : vector<2x64xf32> to vector<2x16xf32>
    %cst_37 = arith.constant 0.000000e+00 : f32
    %106 = vector.broadcast %cst_37 : f32 to vector<2x16xf32>
    %107 = arith.subf %106, %105 : vector<2x16xf32>
    %108 = math.exp %107 : vector<2x16xf32>
    %cst_38 = arith.constant 1.000000e+00 : f32
    %109 = vector.broadcast %cst_38 : f32 to vector<2x16xf32>
    %110 = arith.addf %109, %108 : vector<2x16xf32>
    %cst_39 = arith.constant 1.000000e+00 : f32
    %111 = vector.broadcast %cst_39 : f32 to vector<2x16xf32>
    %112 = arith.divf %111, %110 : vector<2x16xf32>
    %113 = arith.mulf %102, %43 : vector<2x16xf32>
    %114 = arith.mulf %94, %104 : vector<2x16xf32>
    %115 = arith.addf %113, %114 : vector<2x16xf32>
    %116 = math.tanh %115 : vector<2x16xf32>
    %117 = arith.mulf %112, %116 : vector<2x16xf32>
    %118 = tpu.concatenate %117, %80 in 1 : vector<2x16xf32>, vector<2x16xf32> -> vector<2x32xf32>
    %cst_40 = arith.constant dense<0.000000e+00> : vector<2x64xf32>
    %119 = tpu.matmul %118, %3, %cst_40 {dimension_numbers = #tpu.dot_dimension_numbers<[1], [0], [0], [1], [0, 0, 1, 1], [], []>} : vector<2x32xf32>, vector<32x64xf32>, vector<2x64xf32> -> vector<2x64xf32>
    %120 = vector.broadcast %4 : vector<1x64xf32> to vector<2x64xf32>
    %121 = arith.addf %119, %120 : vector<2x64xf32>
    %122 = vector.extract_strided_slice %121 {offsets = [0, 0], sizes = [2, 16], strides = [1, 1]} : vector<2x64xf32> to vector<2x16xf32>
    %cst_41 = arith.constant 0.000000e+00 : f32
    %123 = vector.broadcast %cst_41 : f32 to vector<2x16xf32>
    %124 = arith.subf %123, %122 : vector<2x16xf32>
    %125 = math.exp %124 : vector<2x16xf32>
    %cst_42 = arith.constant 1.000000e+00 : f32
    %126 = vector.broadcast %cst_42 : f32 to vector<2x16xf32>
    %127 = arith.addf %126, %125 : vector<2x16xf32>
    %cst_43 = arith.constant 1.000000e+00 : f32
    %128 = vector.broadcast %cst_43 : f32 to vector<2x16xf32>
    %129 = arith.divf %128, %127 : vector<2x16xf32>
    %130 = vector.extract_strided_slice %121 {offsets = [0, 16], sizes = [2, 16], strides = [1, 1]} : vector<2x64xf32> to vector<2x16xf32>
    %cst_44 = arith.constant 0.000000e+00 : f32
    %131 = vector.broadcast %cst_44 : f32 to vector<2x16xf32>
    %132 = arith.subf %131, %130 : vector<2x16xf32>
    %133 = math.exp %132 : vector<2x16xf32>
    %cst_45 = arith.constant 1.000000e+00 : f32
    %134 = vector.broadcast %cst_45 : f32 to vector<2x16xf32>
    %135 = arith.addf %134, %133 : vector<2x16xf32>
    %cst_46 = arith.constant 1.000000e+00 : f32
    %136 = vector.broadcast %cst_46 : f32 to vector<2x16xf32>
    %137 = arith.divf %136, %135 : vector<2x16xf32>
    %138 = vector.extract_strided_slice %121 {offsets = [0, 32], sizes = [2, 16], strides = [1, 1]} : vector<2x64xf32> to vector<2x16xf32>
    %139 = math.tanh %138 : vector<2x16xf32>
    %140 = vector.extract_strided_slice %121 {offsets = [0, 48], sizes = [2, 16], strides = [1, 1]} : vector<2x64xf32> to vector<2x16xf32>
    %cst_47 = arith.constant 0.000000e+00 : f32
    %141 = vector.broadcast %cst_47 : f32 to vector<2x16xf32>
    %142 = arith.subf %141, %140 : vector<2x16xf32>
    %143 = math.exp %142 : vector<2x16xf32>
    %cst_48 = arith.constant 1.000000e+00 : f32
    %144 = vector.broadcast %cst_48 : f32 to vector<2x16xf32>
    %145 = arith.addf %144, %143 : vector<2x16xf32>
    %cst_49 = arith.constant 1.000000e+00 : f32
    %146 = vector.broadcast %cst_49 : f32 to vector<2x16xf32>
    %147 = arith.divf %146, %145 : vector<2x16xf32>
    %148 = arith.mulf %137, %78 : vector<2x16xf32>
    %149 = arith.mulf %129, %139 : vector<2x16xf32>
    %150 = arith.addf %148, %149 : vector<2x16xf32>
    %151 = math.tanh %150 : vector<2x16xf32>
    %152 = arith.mulf %147, %151 : vector<2x16xf32>
    %153 = vector.extract_strided_slice %0 {offsets = [0, 2, 0], sizes = [2, 1, 32], strides = [1, 1, 1]} : vector<2x8x32xf32> to vector<2x1x32xf32>
    %154 = vector.shape_cast %153 : vector<2x1x32xf32> to vector<2x32xf32>
    %155 = tpu.concatenate %154, %117 in 1 : vector<2x32xf32>, vector<2x16xf32> -> vector<2x48xf32>
    %cst_50 = arith.constant dense<0.000000e+00> : vector<2x64xf32>
    %156 = tpu.matmul %155, %1, %cst_50 {dimension_numbers = #tpu.dot_dimension_numbers<[1], [0], [0], [1], [0, 0, 1, 1], [], []>} : vector<2x48xf32>, vector<48x64xf32>, vector<2x64xf32> -> vector<2x64xf32>
    %157 = vector.broadcast %2 : vector<1x64xf32> to vector<2x64xf32>
    %158 = arith.addf %156, %157 : vector<2x64xf32>
    %159 = vector.extract_strided_slice %158 {offsets = [0, 0], sizes = [2, 16], strides = [1, 1]} : vector<2x64xf32> to vector<2x16xf32>
    %cst_51 = arith.constant 0.000000e+00 : f32
    %160 = vector.broadcast %cst_51 : f32 to vector<2x16xf32>
    %161 = arith.subf %160, %159 : vector<2x16xf32>
    %162 = math.exp %161 : vector<2x16xf32>
    %cst_52 = arith.constant 1.000000e+00 : f32
    %163 = vector.broadcast %cst_52 : f32 to vector<2x16xf32>
    %164 = arith.addf %163, %162 : vector<2x16xf32>
    %cst_53 = arith.constant 1.000000e+00 : f32
    %165 = vector.broadcast %cst_53 : f32 to vector<2x16xf32>
    %166 = arith.divf %165, %164 : vector<2x16xf32>
    %167 = vector.extract_strided_slice %158 {offsets = [0, 16], sizes = [2, 16], strides = [1, 1]} : vector<2x64xf32> to vector<2x16xf32>
    %cst_54 = arith.constant 0.000000e+00 : f32
    %168 = vector.broadcast %cst_54 : f32 to vector<2x16xf32>
    %169 = arith.subf %168, %167 : vector<2x16xf32>
    %170 = math.exp %169 : vector<2x16xf32>
    %cst_55 = arith.constant 1.000000e+00 : f32
    %171 = vector.broadcast %cst_55 : f32 to vector<2x16xf32>
    %172 = arith.addf %171, %170 : vector<2x16xf32>
    %cst_56 = arith.constant 1.000000e+00 : f32
    %173 = vector.broadcast %cst_56 : f32 to vector<2x16xf32>
    %174 = arith.divf %173, %172 : vector<2x16xf32>
    %175 = vector.extract_strided_slice %158 {offsets = [0, 32], sizes = [2, 16], strides = [1, 1]} : vector<2x64xf32> to vector<2x16xf32>
    %176 = math.tanh %175 : vector<2x16xf32>
    %177 = vector.extract_strided_slice %158 {offsets = [0, 48], sizes = [2, 16], strides = [1, 1]} : vector<2x64xf32> to vector<2x16xf32>
    %cst_57 = arith.constant 0.000000e+00 : f32
    %178 = vector.broadcast %cst_57 : f32 to vector<2x16xf32>
    %179 = arith.subf %178, %177 : vector<2x16xf32>
    %180 = math.exp %179 : vector<2x16xf32>
    %cst_58 = arith.constant 1.000000e+00 : f32
    %181 = vector.broadcast %cst_58 : f32 to vector<2x16xf32>
    %182 = arith.addf %181, %180 : vector<2x16xf32>
    %cst_59 = arith.constant 1.000000e+00 : f32
    %183 = vector.broadcast %cst_59 : f32 to vector<2x16xf32>
    %184 = arith.divf %183, %182 : vector<2x16xf32>
    %185 = arith.mulf %174, %115 : vector<2x16xf32>
    %186 = arith.mulf %166, %176 : vector<2x16xf32>
    %187 = arith.addf %185, %186 : vector<2x16xf32>
    %188 = math.tanh %187 : vector<2x16xf32>
    %189 = arith.mulf %184, %188 : vector<2x16xf32>
    %190 = tpu.concatenate %189, %152 in 1 : vector<2x16xf32>, vector<2x16xf32> -> vector<2x32xf32>
    %cst_60 = arith.constant dense<0.000000e+00> : vector<2x64xf32>
    %191 = tpu.matmul %190, %3, %cst_60 {dimension_numbers = #tpu.dot_dimension_numbers<[1], [0], [0], [1], [0, 0, 1, 1], [], []>} : vector<2x32xf32>, vector<32x64xf32>, vector<2x64xf32> -> vector<2x64xf32>
    %192 = vector.broadcast %4 : vector<1x64xf32> to vector<2x64xf32>
    %193 = arith.addf %191, %192 : vector<2x64xf32>
    %194 = vector.extract_strided_slice %193 {offsets = [0, 0], sizes = [2, 16], strides = [1, 1]} : vector<2x64xf32> to vector<2x16xf32>
    %cst_61 = arith.constant 0.000000e+00 : f32
    %195 = vector.broadcast %cst_61 : f32 to vector<2x16xf32>
    %196 = arith.subf %195, %194 : vector<2x16xf32>
    %197 = math.exp %196 : vector<2x16xf32>
    %cst_62 = arith.constant 1.000000e+00 : f32
    %198 = vector.broadcast %cst_62 : f32 to vector<2x16xf32>
    %199 = arith.addf %198, %197 : vector<2x16xf32>
    %cst_63 = arith.constant 1.000000e+00 : f32
    %200 = vector.broadcast %cst_63 : f32 to vector<2x16xf32>
    %201 = arith.divf %200, %199 : vector<2x16xf32>
    %202 = vector.extract_strided_slice %193 {offsets = [0, 16], sizes = [2, 16], strides = [1, 1]} : vector<2x64xf32> to vector<2x16xf32>
    %cst_64 = arith.constant 0.000000e+00 : f32
    %203 = vector.broadcast %cst_64 : f32 to vector<2x16xf32>
    %204 = arith.subf %203, %202 : vector<2x16xf32>
    %205 = math.exp %204 : vector<2x16xf32>
    %cst_65 = arith.constant 1.000000e+00 : f32
    %206 = vector.broadcast %cst_65 : f32 to vector<2x16xf32>
    %207 = arith.addf %206, %205 : vector<2x16xf32>
    %cst_66 = arith.constant 1.000000e+00 : f32
    %208 = vector.broadcast %cst_66 : f32 to vector<2x16xf32>
    %209 = arith.divf %208, %207 : vector<2x16xf32>
    %210 = vector.extract_strided_slice %193 {offsets = [0, 32], sizes = [2, 16], strides = [1, 1]} : vector<2x64xf32> to vector<2x16xf32>
    %211 = math.tanh %210 : vector<2x16xf32>
    %212 = vector.extract_strided_slice %193 {offsets = [0, 48], sizes = [2, 16], strides = [1, 1]} : vector<2x64xf32> to vector<2x16xf32>
    %cst_67 = arith.constant 0.000000e+00 : f32
    %213 = vector.broadcast %cst_67 : f32 to vector<2x16xf32>
    %214 = arith.subf %213, %212 : vector<2x16xf32>
    %215 = math.exp %214 : vector<2x16xf32>
    %cst_68 = arith.constant 1.000000e+00 : f32
    %216 = vector.broadcast %cst_68 : f32 to vector<2x16xf32>
    %217 = arith.addf %216, %215 : vector<2x16xf32>
    %cst_69 = arith.constant 1.000000e+00 : f32
    %218 = vector.broadcast %cst_69 : f32 to vector<2x16xf32>
    %219 = arith.divf %218, %217 : vector<2x16xf32>
    %220 = arith.mulf %209, %150 : vector<2x16xf32>
    %221 = arith.mulf %201, %211 : vector<2x16xf32>
    %222 = arith.addf %220, %221 : vector<2x16xf32>
    %223 = math.tanh %222 : vector<2x16xf32>
    %224 = arith.mulf %219, %223 : vector<2x16xf32>
    %225 = vector.extract_strided_slice %0 {offsets = [0, 3, 0], sizes = [2, 1, 32], strides = [1, 1, 1]} : vector<2x8x32xf32> to vector<2x1x32xf32>
    %226 = vector.shape_cast %225 : vector<2x1x32xf32> to vector<2x32xf32>
    %227 = tpu.concatenate %226, %189 in 1 : vector<2x32xf32>, vector<2x16xf32> -> vector<2x48xf32>
    %cst_70 = arith.constant dense<0.000000e+00> : vector<2x64xf32>
    %228 = tpu.matmul %227, %1, %cst_70 {dimension_numbers = #tpu.dot_dimension_numbers<[1], [0], [0], [1], [0, 0, 1, 1], [], []>} : vector<2x48xf32>, vector<48x64xf32>, vector<2x64xf32> -> vector<2x64xf32>
    %229 = vector.broadcast %2 : vector<1x64xf32> to vector<2x64xf32>
    %230 = arith.addf %228, %229 : vector<2x64xf32>
    %231 = vector.extract_strided_slice %230 {offsets = [0, 0], sizes = [2, 16], strides = [1, 1]} : vector<2x64xf32> to vector<2x16xf32>
    %cst_71 = arith.constant 0.000000e+00 : f32
    %232 = vector.broadcast %cst_71 : f32 to vector<2x16xf32>
    %233 = arith.subf %232, %231 : vector<2x16xf32>
    %234 = math.exp %233 : vector<2x16xf32>
    %cst_72 = arith.constant 1.000000e+00 : f32
    %235 = vector.broadcast %cst_72 : f32 to vector<2x16xf32>
    %236 = arith.addf %235, %234 : vector<2x16xf32>
    %cst_73 = arith.constant 1.000000e+00 : f32
    %237 = vector.broadcast %cst_73 : f32 to vector<2x16xf32>
    %238 = arith.divf %237, %236 : vector<2x16xf32>
    %239 = vector.extract_strided_slice %230 {offsets = [0, 16], sizes = [2, 16], strides = [1, 1]} : vector<2x64xf32> to vector<2x16xf32>
    %cst_74 = arith.constant 0.000000e+00 : f32
    %240 = vector.broadcast %cst_74 : f32 to vector<2x16xf32>
    %241 = arith.subf %240, %239 : vector<2x16xf32>
    %242 = math.exp %241 : vector<2x16xf32>
    %cst_75 = arith.constant 1.000000e+00 : f32
    %243 = vector.broadcast %cst_75 : f32 to vector<2x16xf32>
    %244 = arith.addf %243, %242 : vector<2x16xf32>
    %cst_76 = arith.constant 1.000000e+00 : f32
    %245 = vector.broadcast %cst_76 : f32 to vector<2x16xf32>
    %246 = arith.divf %245, %244 : vector<2x16xf32>
    %247 = vector.extract_strided_slice %230 {offsets = [0, 32], sizes = [2, 16], strides = [1, 1]} : vector<2x64xf32> to vector<2x16xf32>
    %248 = math.tanh %247 : vector<2x16xf32>
    %249 = vector.extract_strided_slice %230 {offsets = [0, 48], sizes = [2, 16], strides = [1, 1]} : vector<2x64xf32> to vector<2x16xf32>
    %cst_77 = arith.constant 0.000000e+00 : f32
    %250 = vector.broadcast %cst_77 : f32 to vector<2x16xf32>
    %251 = arith.subf %250, %249 : vector<2x16xf32>
    %252 = math.exp %251 : vector<2x16xf32>
    %cst_78 = arith.constant 1.000000e+00 : f32
    %253 = vector.broadcast %cst_78 : f32 to vector<2x16xf32>
    %254 = arith.addf %253, %252 : vector<2x16xf32>
    %cst_79 = arith.constant 1.000000e+00 : f32
    %255 = vector.broadcast %cst_79 : f32 to vector<2x16xf32>
    %256 = arith.divf %255, %254 : vector<2x16xf32>
    %257 = arith.mulf %246, %187 : vector<2x16xf32>
    %258 = arith.mulf %238, %248 : vector<2x16xf32>
    %259 = arith.addf %257, %258 : vector<2x16xf32>
    %260 = math.tanh %259 : vector<2x16xf32>
    %261 = arith.mulf %256, %260 : vector<2x16xf32>
    %262 = tpu.concatenate %261, %224 in 1 : vector<2x16xf32>, vector<2x16xf32> -> vector<2x32xf32>
    %cst_80 = arith.constant dense<0.000000e+00> : vector<2x64xf32>
    %263 = tpu.matmul %262, %3, %cst_80 {dimension_numbers = #tpu.dot_dimension_numbers<[1], [0], [0], [1], [0, 0, 1, 1], [], []>} : vector<2x32xf32>, vector<32x64xf32>, vector<2x64xf32> -> vector<2x64xf32>
    %264 = vector.broadcast %4 : vector<1x64xf32> to vector<2x64xf32>
    %265 = arith.addf %263, %264 : vector<2x64xf32>
    %266 = vector.extract_strided_slice %265 {offsets = [0, 0], sizes = [2, 16], strides = [1, 1]} : vector<2x64xf32> to vector<2x16xf32>
    %cst_81 = arith.constant 0.000000e+00 : f32
    %267 = vector.broadcast %cst_81 : f32 to vector<2x16xf32>
    %268 = arith.subf %267, %266 : vector<2x16xf32>
    %269 = math.exp %268 : vector<2x16xf32>
    %cst_82 = arith.constant 1.000000e+00 : f32
    %270 = vector.broadcast %cst_82 : f32 to vector<2x16xf32>
    %271 = arith.addf %270, %269 : vector<2x16xf32>
    %cst_83 = arith.constant 1.000000e+00 : f32
    %272 = vector.broadcast %cst_83 : f32 to vector<2x16xf32>
    %273 = arith.divf %272, %271 : vector<2x16xf32>
    %274 = vector.extract_strided_slice %265 {offsets = [0, 16], sizes = [2, 16], strides = [1, 1]} : vector<2x64xf32> to vector<2x16xf32>
    %cst_84 = arith.constant 0.000000e+00 : f32
    %275 = vector.broadcast %cst_84 : f32 to vector<2x16xf32>
    %276 = arith.subf %275, %274 : vector<2x16xf32>
    %277 = math.exp %276 : vector<2x16xf32>
    %cst_85 = arith.constant 1.000000e+00 : f32
    %278 = vector.broadcast %cst_85 : f32 to vector<2x16xf32>
    %279 = arith.addf %278, %277 : vector<2x16xf32>
    %cst_86 = arith.constant 1.000000e+00 : f32
    %280 = vector.broadcast %cst_86 : f32 to vector<2x16xf32>
    %281 = arith.divf %280, %279 : vector<2x16xf32>
    %282 = vector.extract_strided_slice %265 {offsets = [0, 32], sizes = [2, 16], strides = [1, 1]} : vector<2x64xf32> to vector<2x16xf32>
    %283 = math.tanh %282 : vector<2x16xf32>
    %284 = vector.extract_strided_slice %265 {offsets = [0, 48], sizes = [2, 16], strides = [1, 1]} : vector<2x64xf32> to vector<2x16xf32>
    %cst_87 = arith.constant 0.000000e+00 : f32
    %285 = vector.broadcast %cst_87 : f32 to vector<2x16xf32>
    %286 = arith.subf %285, %284 : vector<2x16xf32>
    %287 = math.exp %286 : vector<2x16xf32>
    %cst_88 = arith.constant 1.000000e+00 : f32
    %288 = vector.broadcast %cst_88 : f32 to vector<2x16xf32>
    %289 = arith.addf %288, %287 : vector<2x16xf32>
    %cst_89 = arith.constant 1.000000e+00 : f32
    %290 = vector.broadcast %cst_89 : f32 to vector<2x16xf32>
    %291 = arith.divf %290, %289 : vector<2x16xf32>
    %292 = arith.mulf %281, %222 : vector<2x16xf32>
    %293 = arith.mulf %273, %283 : vector<2x16xf32>
    %294 = arith.addf %292, %293 : vector<2x16xf32>
    %295 = math.tanh %294 : vector<2x16xf32>
    %296 = arith.mulf %291, %295 : vector<2x16xf32>
    %297 = vector.extract_strided_slice %0 {offsets = [0, 4, 0], sizes = [2, 1, 32], strides = [1, 1, 1]} : vector<2x8x32xf32> to vector<2x1x32xf32>
    %298 = vector.shape_cast %297 : vector<2x1x32xf32> to vector<2x32xf32>
    %299 = tpu.concatenate %298, %261 in 1 : vector<2x32xf32>, vector<2x16xf32> -> vector<2x48xf32>
    %cst_90 = arith.constant dense<0.000000e+00> : vector<2x64xf32>
    %300 = tpu.matmul %299, %1, %cst_90 {dimension_numbers = #tpu.dot_dimension_numbers<[1], [0], [0], [1], [0, 0, 1, 1], [], []>} : vector<2x48xf32>, vector<48x64xf32>, vector<2x64xf32> -> vector<2x64xf32>
    %301 = vector.broadcast %2 : vector<1x64xf32> to vector<2x64xf32>
    %302 = arith.addf %300, %301 : vector<2x64xf32>
    %303 = vector.extract_strided_slice %302 {offsets = [0, 0], sizes = [2, 16], strides = [1, 1]} : vector<2x64xf32> to vector<2x16xf32>
    %cst_91 = arith.constant 0.000000e+00 : f32
    %304 = vector.broadcast %cst_91 : f32 to vector<2x16xf32>
    %305 = arith.subf %304, %303 : vector<2x16xf32>
    %306 = math.exp %305 : vector<2x16xf32>
    %cst_92 = arith.constant 1.000000e+00 : f32
    %307 = vector.broadcast %cst_92 : f32 to vector<2x16xf32>
    %308 = arith.addf %307, %306 : vector<2x16xf32>
    %cst_93 = arith.constant 1.000000e+00 : f32
    %309 = vector.broadcast %cst_93 : f32 to vector<2x16xf32>
    %310 = arith.divf %309, %308 : vector<2x16xf32>
    %311 = vector.extract_strided_slice %302 {offsets = [0, 16], sizes = [2, 16], strides = [1, 1]} : vector<2x64xf32> to vector<2x16xf32>
    %cst_94 = arith.constant 0.000000e+00 : f32
    %312 = vector.broadcast %cst_94 : f32 to vector<2x16xf32>
    %313 = arith.subf %312, %311 : vector<2x16xf32>
    %314 = math.exp %313 : vector<2x16xf32>
    %cst_95 = arith.constant 1.000000e+00 : f32
    %315 = vector.broadcast %cst_95 : f32 to vector<2x16xf32>
    %316 = arith.addf %315, %314 : vector<2x16xf32>
    %cst_96 = arith.constant 1.000000e+00 : f32
    %317 = vector.broadcast %cst_96 : f32 to vector<2x16xf32>
    %318 = arith.divf %317, %316 : vector<2x16xf32>
    %319 = vector.extract_strided_slice %302 {offsets = [0, 32], sizes = [2, 16], strides = [1, 1]} : vector<2x64xf32> to vector<2x16xf32>
    %320 = math.tanh %319 : vector<2x16xf32>
    %321 = vector.extract_strided_slice %302 {offsets = [0, 48], sizes = [2, 16], strides = [1, 1]} : vector<2x64xf32> to vector<2x16xf32>
    %cst_97 = arith.constant 0.000000e+00 : f32
    %322 = vector.broadcast %cst_97 : f32 to vector<2x16xf32>
    %323 = arith.subf %322, %321 : vector<2x16xf32>
    %324 = math.exp %323 : vector<2x16xf32>
    %cst_98 = arith.constant 1.000000e+00 : f32
    %325 = vector.broadcast %cst_98 : f32 to vector<2x16xf32>
    %326 = arith.addf %325, %324 : vector<2x16xf32>
    %cst_99 = arith.constant 1.000000e+00 : f32
    %327 = vector.broadcast %cst_99 : f32 to vector<2x16xf32>
    %328 = arith.divf %327, %326 : vector<2x16xf32>
    %329 = arith.mulf %318, %259 : vector<2x16xf32>
    %330 = arith.mulf %310, %320 : vector<2x16xf32>
    %331 = arith.addf %329, %330 : vector<2x16xf32>
    %332 = math.tanh %331 : vector<2x16xf32>
    %333 = arith.mulf %328, %332 : vector<2x16xf32>
    %334 = tpu.concatenate %333, %296 in 1 : vector<2x16xf32>, vector<2x16xf32> -> vector<2x32xf32>
    %cst_100 = arith.constant dense<0.000000e+00> : vector<2x64xf32>
    %335 = tpu.matmul %334, %3, %cst_100 {dimension_numbers = #tpu.dot_dimension_numbers<[1], [0], [0], [1], [0, 0, 1, 1], [], []>} : vector<2x32xf32>, vector<32x64xf32>, vector<2x64xf32> -> vector<2x64xf32>
    %336 = vector.broadcast %4 : vector<1x64xf32> to vector<2x64xf32>
    %337 = arith.addf %335, %336 : vector<2x64xf32>
    %338 = vector.extract_strided_slice %337 {offsets = [0, 0], sizes = [2, 16], strides = [1, 1]} : vector<2x64xf32> to vector<2x16xf32>
    %cst_101 = arith.constant 0.000000e+00 : f32
    %339 = vector.broadcast %cst_101 : f32 to vector<2x16xf32>
    %340 = arith.subf %339, %338 : vector<2x16xf32>
    %341 = math.exp %340 : vector<2x16xf32>
    %cst_102 = arith.constant 1.000000e+00 : f32
    %342 = vector.broadcast %cst_102 : f32 to vector<2x16xf32>
    %343 = arith.addf %342, %341 : vector<2x16xf32>
    %cst_103 = arith.constant 1.000000e+00 : f32
    %344 = vector.broadcast %cst_103 : f32 to vector<2x16xf32>
    %345 = arith.divf %344, %343 : vector<2x16xf32>
    %346 = vector.extract_strided_slice %337 {offsets = [0, 16], sizes = [2, 16], strides = [1, 1]} : vector<2x64xf32> to vector<2x16xf32>
    %cst_104 = arith.constant 0.000000e+00 : f32
    %347 = vector.broadcast %cst_104 : f32 to vector<2x16xf32>
    %348 = arith.subf %347, %346 : vector<2x16xf32>
    %349 = math.exp %348 : vector<2x16xf32>
    %cst_105 = arith.constant 1.000000e+00 : f32
    %350 = vector.broadcast %cst_105 : f32 to vector<2x16xf32>
    %351 = arith.addf %350, %349 : vector<2x16xf32>
    %cst_106 = arith.constant 1.000000e+00 : f32
    %352 = vector.broadcast %cst_106 : f32 to vector<2x16xf32>
    %353 = arith.divf %352, %351 : vector<2x16xf32>
    %354 = vector.extract_strided_slice %337 {offsets = [0, 32], sizes = [2, 16], strides = [1, 1]} : vector<2x64xf32> to vector<2x16xf32>
    %355 = math.tanh %354 : vector<2x16xf32>
    %356 = vector.extract_strided_slice %337 {offsets = [0, 48], sizes = [2, 16], strides = [1, 1]} : vector<2x64xf32> to vector<2x16xf32>
    %cst_107 = arith.constant 0.000000e+00 : f32
    %357 = vector.broadcast %cst_107 : f32 to vector<2x16xf32>
    %358 = arith.subf %357, %356 : vector<2x16xf32>
    %359 = math.exp %358 : vector<2x16xf32>
    %cst_108 = arith.constant 1.000000e+00 : f32
    %360 = vector.broadcast %cst_108 : f32 to vector<2x16xf32>
    %361 = arith.addf %360, %359 : vector<2x16xf32>
    %cst_109 = arith.constant 1.000000e+00 : f32
    %362 = vector.broadcast %cst_109 : f32 to vector<2x16xf32>
    %363 = arith.divf %362, %361 : vector<2x16xf32>
    %364 = arith.mulf %353, %294 : vector<2x16xf32>
    %365 = arith.mulf %345, %355 : vector<2x16xf32>
    %366 = arith.addf %364, %365 : vector<2x16xf32>
    %367 = math.tanh %366 : vector<2x16xf32>
    %368 = arith.mulf %363, %367 : vector<2x16xf32>
    %369 = vector.extract_strided_slice %0 {offsets = [0, 5, 0], sizes = [2, 1, 32], strides = [1, 1, 1]} : vector<2x8x32xf32> to vector<2x1x32xf32>
    %370 = vector.shape_cast %369 : vector<2x1x32xf32> to vector<2x32xf32>
    %371 = tpu.concatenate %370, %333 in 1 : vector<2x32xf32>, vector<2x16xf32> -> vector<2x48xf32>
    %cst_110 = arith.constant dense<0.000000e+00> : vector<2x64xf32>
    %372 = tpu.matmul %371, %1, %cst_110 {dimension_numbers = #tpu.dot_dimension_numbers<[1], [0], [0], [1], [0, 0, 1, 1], [], []>} : vector<2x48xf32>, vector<48x64xf32>, vector<2x64xf32> -> vector<2x64xf32>
    %373 = vector.broadcast %2 : vector<1x64xf32> to vector<2x64xf32>
    %374 = arith.addf %372, %373 : vector<2x64xf32>
    %375 = vector.extract_strided_slice %374 {offsets = [0, 0], sizes = [2, 16], strides = [1, 1]} : vector<2x64xf32> to vector<2x16xf32>
    %cst_111 = arith.constant 0.000000e+00 : f32
    %376 = vector.broadcast %cst_111 : f32 to vector<2x16xf32>
    %377 = arith.subf %376, %375 : vector<2x16xf32>
    %378 = math.exp %377 : vector<2x16xf32>
    %cst_112 = arith.constant 1.000000e+00 : f32
    %379 = vector.broadcast %cst_112 : f32 to vector<2x16xf32>
    %380 = arith.addf %379, %378 : vector<2x16xf32>
    %cst_113 = arith.constant 1.000000e+00 : f32
    %381 = vector.broadcast %cst_113 : f32 to vector<2x16xf32>
    %382 = arith.divf %381, %380 : vector<2x16xf32>
    %383 = vector.extract_strided_slice %374 {offsets = [0, 16], sizes = [2, 16], strides = [1, 1]} : vector<2x64xf32> to vector<2x16xf32>
    %cst_114 = arith.constant 0.000000e+00 : f32
    %384 = vector.broadcast %cst_114 : f32 to vector<2x16xf32>
    %385 = arith.subf %384, %383 : vector<2x16xf32>
    %386 = math.exp %385 : vector<2x16xf32>
    %cst_115 = arith.constant 1.000000e+00 : f32
    %387 = vector.broadcast %cst_115 : f32 to vector<2x16xf32>
    %388 = arith.addf %387, %386 : vector<2x16xf32>
    %cst_116 = arith.constant 1.000000e+00 : f32
    %389 = vector.broadcast %cst_116 : f32 to vector<2x16xf32>
    %390 = arith.divf %389, %388 : vector<2x16xf32>
    %391 = vector.extract_strided_slice %374 {offsets = [0, 32], sizes = [2, 16], strides = [1, 1]} : vector<2x64xf32> to vector<2x16xf32>
    %392 = math.tanh %391 : vector<2x16xf32>
    %393 = vector.extract_strided_slice %374 {offsets = [0, 48], sizes = [2, 16], strides = [1, 1]} : vector<2x64xf32> to vector<2x16xf32>
    %cst_117 = arith.constant 0.000000e+00 : f32
    %394 = vector.broadcast %cst_117 : f32 to vector<2x16xf32>
    %395 = arith.subf %394, %393 : vector<2x16xf32>
    %396 = math.exp %395 : vector<2x16xf32>
    %cst_118 = arith.constant 1.000000e+00 : f32
    %397 = vector.broadcast %cst_118 : f32 to vector<2x16xf32>
    %398 = arith.addf %397, %396 : vector<2x16xf32>
    %cst_119 = arith.constant 1.000000e+00 : f32
    %399 = vector.broadcast %cst_119 : f32 to vector<2x16xf32>
    %400 = arith.divf %399, %398 : vector<2x16xf32>
    %401 = arith.mulf %390, %331 : vector<2x16xf32>
    %402 = arith.mulf %382, %392 : vector<2x16xf32>
    %403 = arith.addf %401, %402 : vector<2x16xf32>
    %404 = math.tanh %403 : vector<2x16xf32>
    %405 = arith.mulf %400, %404 : vector<2x16xf32>
    %406 = tpu.concatenate %405, %368 in 1 : vector<2x16xf32>, vector<2x16xf32> -> vector<2x32xf32>
    %cst_120 = arith.constant dense<0.000000e+00> : vector<2x64xf32>
    %407 = tpu.matmul %406, %3, %cst_120 {dimension_numbers = #tpu.dot_dimension_numbers<[1], [0], [0], [1], [0, 0, 1, 1], [], []>} : vector<2x32xf32>, vector<32x64xf32>, vector<2x64xf32> -> vector<2x64xf32>
    %408 = vector.broadcast %4 : vector<1x64xf32> to vector<2x64xf32>
    %409 = arith.addf %407, %408 : vector<2x64xf32>
    %410 = vector.extract_strided_slice %409 {offsets = [0, 0], sizes = [2, 16], strides = [1, 1]} : vector<2x64xf32> to vector<2x16xf32>
    %cst_121 = arith.constant 0.000000e+00 : f32
    %411 = vector.broadcast %cst_121 : f32 to vector<2x16xf32>
    %412 = arith.subf %411, %410 : vector<2x16xf32>
    %413 = math.exp %412 : vector<2x16xf32>
    %cst_122 = arith.constant 1.000000e+00 : f32
    %414 = vector.broadcast %cst_122 : f32 to vector<2x16xf32>
    %415 = arith.addf %414, %413 : vector<2x16xf32>
    %cst_123 = arith.constant 1.000000e+00 : f32
    %416 = vector.broadcast %cst_123 : f32 to vector<2x16xf32>
    %417 = arith.divf %416, %415 : vector<2x16xf32>
    %418 = vector.extract_strided_slice %409 {offsets = [0, 16], sizes = [2, 16], strides = [1, 1]} : vector<2x64xf32> to vector<2x16xf32>
    %cst_124 = arith.constant 0.000000e+00 : f32
    %419 = vector.broadcast %cst_124 : f32 to vector<2x16xf32>
    %420 = arith.subf %419, %418 : vector<2x16xf32>
    %421 = math.exp %420 : vector<2x16xf32>
    %cst_125 = arith.constant 1.000000e+00 : f32
    %422 = vector.broadcast %cst_125 : f32 to vector<2x16xf32>
    %423 = arith.addf %422, %421 : vector<2x16xf32>
    %cst_126 = arith.constant 1.000000e+00 : f32
    %424 = vector.broadcast %cst_126 : f32 to vector<2x16xf32>
    %425 = arith.divf %424, %423 : vector<2x16xf32>
    %426 = vector.extract_strided_slice %409 {offsets = [0, 32], sizes = [2, 16], strides = [1, 1]} : vector<2x64xf32> to vector<2x16xf32>
    %427 = math.tanh %426 : vector<2x16xf32>
    %428 = vector.extract_strided_slice %409 {offsets = [0, 48], sizes = [2, 16], strides = [1, 1]} : vector<2x64xf32> to vector<2x16xf32>
    %cst_127 = arith.constant 0.000000e+00 : f32
    %429 = vector.broadcast %cst_127 : f32 to vector<2x16xf32>
    %430 = arith.subf %429, %428 : vector<2x16xf32>
    %431 = math.exp %430 : vector<2x16xf32>
    %cst_128 = arith.constant 1.000000e+00 : f32
    %432 = vector.broadcast %cst_128 : f32 to vector<2x16xf32>
    %433 = arith.addf %432, %431 : vector<2x16xf32>
    %cst_129 = arith.constant 1.000000e+00 : f32
    %434 = vector.broadcast %cst_129 : f32 to vector<2x16xf32>
    %435 = arith.divf %434, %433 : vector<2x16xf32>
    %436 = arith.mulf %425, %366 : vector<2x16xf32>
    %437 = arith.mulf %417, %427 : vector<2x16xf32>
    %438 = arith.addf %436, %437 : vector<2x16xf32>
    %439 = math.tanh %438 : vector<2x16xf32>
    %440 = arith.mulf %435, %439 : vector<2x16xf32>
    %441 = vector.extract_strided_slice %0 {offsets = [0, 6, 0], sizes = [2, 1, 32], strides = [1, 1, 1]} : vector<2x8x32xf32> to vector<2x1x32xf32>
    %442 = vector.shape_cast %441 : vector<2x1x32xf32> to vector<2x32xf32>
    %443 = tpu.concatenate %442, %405 in 1 : vector<2x32xf32>, vector<2x16xf32> -> vector<2x48xf32>
    %cst_130 = arith.constant dense<0.000000e+00> : vector<2x64xf32>
    %444 = tpu.matmul %443, %1, %cst_130 {dimension_numbers = #tpu.dot_dimension_numbers<[1], [0], [0], [1], [0, 0, 1, 1], [], []>} : vector<2x48xf32>, vector<48x64xf32>, vector<2x64xf32> -> vector<2x64xf32>
    %445 = vector.broadcast %2 : vector<1x64xf32> to vector<2x64xf32>
    %446 = arith.addf %444, %445 : vector<2x64xf32>
    %447 = vector.extract_strided_slice %446 {offsets = [0, 0], sizes = [2, 16], strides = [1, 1]} : vector<2x64xf32> to vector<2x16xf32>
    %cst_131 = arith.constant 0.000000e+00 : f32
    %448 = vector.broadcast %cst_131 : f32 to vector<2x16xf32>
    %449 = arith.subf %448, %447 : vector<2x16xf32>
    %450 = math.exp %449 : vector<2x16xf32>
    %cst_132 = arith.constant 1.000000e+00 : f32
    %451 = vector.broadcast %cst_132 : f32 to vector<2x16xf32>
    %452 = arith.addf %451, %450 : vector<2x16xf32>
    %cst_133 = arith.constant 1.000000e+00 : f32
    %453 = vector.broadcast %cst_133 : f32 to vector<2x16xf32>
    %454 = arith.divf %453, %452 : vector<2x16xf32>
    %455 = vector.extract_strided_slice %446 {offsets = [0, 16], sizes = [2, 16], strides = [1, 1]} : vector<2x64xf32> to vector<2x16xf32>
    %cst_134 = arith.constant 0.000000e+00 : f32
    %456 = vector.broadcast %cst_134 : f32 to vector<2x16xf32>
    %457 = arith.subf %456, %455 : vector<2x16xf32>
    %458 = math.exp %457 : vector<2x16xf32>
    %cst_135 = arith.constant 1.000000e+00 : f32
    %459 = vector.broadcast %cst_135 : f32 to vector<2x16xf32>
    %460 = arith.addf %459, %458 : vector<2x16xf32>
    %cst_136 = arith.constant 1.000000e+00 : f32
    %461 = vector.broadcast %cst_136 : f32 to vector<2x16xf32>
    %462 = arith.divf %461, %460 : vector<2x16xf32>
    %463 = vector.extract_strided_slice %446 {offsets = [0, 32], sizes = [2, 16], strides = [1, 1]} : vector<2x64xf32> to vector<2x16xf32>
    %464 = math.tanh %463 : vector<2x16xf32>
    %465 = vector.extract_strided_slice %446 {offsets = [0, 48], sizes = [2, 16], strides = [1, 1]} : vector<2x64xf32> to vector<2x16xf32>
    %cst_137 = arith.constant 0.000000e+00 : f32
    %466 = vector.broadcast %cst_137 : f32 to vector<2x16xf32>
    %467 = arith.subf %466, %465 : vector<2x16xf32>
    %468 = math.exp %467 : vector<2x16xf32>
    %cst_138 = arith.constant 1.000000e+00 : f32
    %469 = vector.broadcast %cst_138 : f32 to vector<2x16xf32>
    %470 = arith.addf %469, %468 : vector<2x16xf32>
    %cst_139 = arith.constant 1.000000e+00 : f32
    %471 = vector.broadcast %cst_139 : f32 to vector<2x16xf32>
    %472 = arith.divf %471, %470 : vector<2x16xf32>
    %473 = arith.mulf %462, %403 : vector<2x16xf32>
    %474 = arith.mulf %454, %464 : vector<2x16xf32>
    %475 = arith.addf %473, %474 : vector<2x16xf32>
    %476 = math.tanh %475 : vector<2x16xf32>
    %477 = arith.mulf %472, %476 : vector<2x16xf32>
    %478 = tpu.concatenate %477, %440 in 1 : vector<2x16xf32>, vector<2x16xf32> -> vector<2x32xf32>
    %cst_140 = arith.constant dense<0.000000e+00> : vector<2x64xf32>
    %479 = tpu.matmul %478, %3, %cst_140 {dimension_numbers = #tpu.dot_dimension_numbers<[1], [0], [0], [1], [0, 0, 1, 1], [], []>} : vector<2x32xf32>, vector<32x64xf32>, vector<2x64xf32> -> vector<2x64xf32>
    %480 = vector.broadcast %4 : vector<1x64xf32> to vector<2x64xf32>
    %481 = arith.addf %479, %480 : vector<2x64xf32>
    %482 = vector.extract_strided_slice %481 {offsets = [0, 0], sizes = [2, 16], strides = [1, 1]} : vector<2x64xf32> to vector<2x16xf32>
    %cst_141 = arith.constant 0.000000e+00 : f32
    %483 = vector.broadcast %cst_141 : f32 to vector<2x16xf32>
    %484 = arith.subf %483, %482 : vector<2x16xf32>
    %485 = math.exp %484 : vector<2x16xf32>
    %cst_142 = arith.constant 1.000000e+00 : f32
    %486 = vector.broadcast %cst_142 : f32 to vector<2x16xf32>
    %487 = arith.addf %486, %485 : vector<2x16xf32>
    %cst_143 = arith.constant 1.000000e+00 : f32
    %488 = vector.broadcast %cst_143 : f32 to vector<2x16xf32>
    %489 = arith.divf %488, %487 : vector<2x16xf32>
    %490 = vector.extract_strided_slice %481 {offsets = [0, 16], sizes = [2, 16], strides = [1, 1]} : vector<2x64xf32> to vector<2x16xf32>
    %cst_144 = arith.constant 0.000000e+00 : f32
    %491 = vector.broadcast %cst_144 : f32 to vector<2x16xf32>
    %492 = arith.subf %491, %490 : vector<2x16xf32>
    %493 = math.exp %492 : vector<2x16xf32>
    %cst_145 = arith.constant 1.000000e+00 : f32
    %494 = vector.broadcast %cst_145 : f32 to vector<2x16xf32>
    %495 = arith.addf %494, %493 : vector<2x16xf32>
    %cst_146 = arith.constant 1.000000e+00 : f32
    %496 = vector.broadcast %cst_146 : f32 to vector<2x16xf32>
    %497 = arith.divf %496, %495 : vector<2x16xf32>
    %498 = vector.extract_strided_slice %481 {offsets = [0, 32], sizes = [2, 16], strides = [1, 1]} : vector<2x64xf32> to vector<2x16xf32>
    %499 = math.tanh %498 : vector<2x16xf32>
    %500 = vector.extract_strided_slice %481 {offsets = [0, 48], sizes = [2, 16], strides = [1, 1]} : vector<2x64xf32> to vector<2x16xf32>
    %cst_147 = arith.constant 0.000000e+00 : f32
    %501 = vector.broadcast %cst_147 : f32 to vector<2x16xf32>
    %502 = arith.subf %501, %500 : vector<2x16xf32>
    %503 = math.exp %502 : vector<2x16xf32>
    %cst_148 = arith.constant 1.000000e+00 : f32
    %504 = vector.broadcast %cst_148 : f32 to vector<2x16xf32>
    %505 = arith.addf %504, %503 : vector<2x16xf32>
    %cst_149 = arith.constant 1.000000e+00 : f32
    %506 = vector.broadcast %cst_149 : f32 to vector<2x16xf32>
    %507 = arith.divf %506, %505 : vector<2x16xf32>
    %508 = arith.mulf %497, %438 : vector<2x16xf32>
    %509 = arith.mulf %489, %499 : vector<2x16xf32>
    %510 = arith.addf %508, %509 : vector<2x16xf32>
    %511 = math.tanh %510 : vector<2x16xf32>
    %512 = arith.mulf %507, %511 : vector<2x16xf32>
    %513 = vector.extract_strided_slice %0 {offsets = [0, 7, 0], sizes = [2, 1, 32], strides = [1, 1, 1]} : vector<2x8x32xf32> to vector<2x1x32xf32>
    %514 = vector.shape_cast %513 : vector<2x1x32xf32> to vector<2x32xf32>
    %515 = tpu.concatenate %514, %477 in 1 : vector<2x32xf32>, vector<2x16xf32> -> vector<2x48xf32>
    %cst_150 = arith.constant dense<0.000000e+00> : vector<2x64xf32>
    %516 = tpu.matmul %515, %1, %cst_150 {dimension_numbers = #tpu.dot_dimension_numbers<[1], [0], [0], [1], [0, 0, 1, 1], [], []>} : vector<2x48xf32>, vector<48x64xf32>, vector<2x64xf32> -> vector<2x64xf32>
    %517 = vector.broadcast %2 : vector<1x64xf32> to vector<2x64xf32>
    %518 = arith.addf %516, %517 : vector<2x64xf32>
    %519 = vector.extract_strided_slice %518 {offsets = [0, 0], sizes = [2, 16], strides = [1, 1]} : vector<2x64xf32> to vector<2x16xf32>
    %cst_151 = arith.constant 0.000000e+00 : f32
    %520 = vector.broadcast %cst_151 : f32 to vector<2x16xf32>
    %521 = arith.subf %520, %519 : vector<2x16xf32>
    %522 = math.exp %521 : vector<2x16xf32>
    %cst_152 = arith.constant 1.000000e+00 : f32
    %523 = vector.broadcast %cst_152 : f32 to vector<2x16xf32>
    %524 = arith.addf %523, %522 : vector<2x16xf32>
    %cst_153 = arith.constant 1.000000e+00 : f32
    %525 = vector.broadcast %cst_153 : f32 to vector<2x16xf32>
    %526 = arith.divf %525, %524 : vector<2x16xf32>
    %527 = vector.extract_strided_slice %518 {offsets = [0, 16], sizes = [2, 16], strides = [1, 1]} : vector<2x64xf32> to vector<2x16xf32>
    %cst_154 = arith.constant 0.000000e+00 : f32
    %528 = vector.broadcast %cst_154 : f32 to vector<2x16xf32>
    %529 = arith.subf %528, %527 : vector<2x16xf32>
    %530 = math.exp %529 : vector<2x16xf32>
    %cst_155 = arith.constant 1.000000e+00 : f32
    %531 = vector.broadcast %cst_155 : f32 to vector<2x16xf32>
    %532 = arith.addf %531, %530 : vector<2x16xf32>
    %cst_156 = arith.constant 1.000000e+00 : f32
    %533 = vector.broadcast %cst_156 : f32 to vector<2x16xf32>
    %534 = arith.divf %533, %532 : vector<2x16xf32>
    %535 = vector.extract_strided_slice %518 {offsets = [0, 32], sizes = [2, 16], strides = [1, 1]} : vector<2x64xf32> to vector<2x16xf32>
    %536 = math.tanh %535 : vector<2x16xf32>
    %537 = vector.extract_strided_slice %518 {offsets = [0, 48], sizes = [2, 16], strides = [1, 1]} : vector<2x64xf32> to vector<2x16xf32>
    %cst_157 = arith.constant 0.000000e+00 : f32
    %538 = vector.broadcast %cst_157 : f32 to vector<2x16xf32>
    %539 = arith.subf %538, %537 : vector<2x16xf32>
    %540 = math.exp %539 : vector<2x16xf32>
    %cst_158 = arith.constant 1.000000e+00 : f32
    %541 = vector.broadcast %cst_158 : f32 to vector<2x16xf32>
    %542 = arith.addf %541, %540 : vector<2x16xf32>
    %cst_159 = arith.constant 1.000000e+00 : f32
    %543 = vector.broadcast %cst_159 : f32 to vector<2x16xf32>
    %544 = arith.divf %543, %542 : vector<2x16xf32>
    %545 = arith.mulf %534, %475 : vector<2x16xf32>
    %546 = arith.mulf %526, %536 : vector<2x16xf32>
    %547 = arith.addf %545, %546 : vector<2x16xf32>
    %548 = math.tanh %547 : vector<2x16xf32>
    %549 = arith.mulf %544, %548 : vector<2x16xf32>
    %550 = tpu.concatenate %549, %512 in 1 : vector<2x16xf32>, vector<2x16xf32> -> vector<2x32xf32>
    %cst_160 = arith.constant dense<0.000000e+00> : vector<2x64xf32>
    %551 = tpu.matmul %550, %3, %cst_160 {dimension_numbers = #tpu.dot_dimension_numbers<[1], [0], [0], [1], [0, 0, 1, 1], [], []>} : vector<2x32xf32>, vector<32x64xf32>, vector<2x64xf32> -> vector<2x64xf32>
    %552 = vector.broadcast %4 : vector<1x64xf32> to vector<2x64xf32>
    %553 = arith.addf %551, %552 : vector<2x64xf32>
    %554 = vector.extract_strided_slice %553 {offsets = [0, 0], sizes = [2, 16], strides = [1, 1]} : vector<2x64xf32> to vector<2x16xf32>
    %cst_161 = arith.constant 0.000000e+00 : f32
    %555 = vector.broadcast %cst_161 : f32 to vector<2x16xf32>
    %556 = arith.subf %555, %554 : vector<2x16xf32>
    %557 = math.exp %556 : vector<2x16xf32>
    %cst_162 = arith.constant 1.000000e+00 : f32
    %558 = vector.broadcast %cst_162 : f32 to vector<2x16xf32>
    %559 = arith.addf %558, %557 : vector<2x16xf32>
    %cst_163 = arith.constant 1.000000e+00 : f32
    %560 = vector.broadcast %cst_163 : f32 to vector<2x16xf32>
    %561 = arith.divf %560, %559 : vector<2x16xf32>
    %562 = vector.extract_strided_slice %553 {offsets = [0, 16], sizes = [2, 16], strides = [1, 1]} : vector<2x64xf32> to vector<2x16xf32>
    %cst_164 = arith.constant 0.000000e+00 : f32
    %563 = vector.broadcast %cst_164 : f32 to vector<2x16xf32>
    %564 = arith.subf %563, %562 : vector<2x16xf32>
    %565 = math.exp %564 : vector<2x16xf32>
    %cst_165 = arith.constant 1.000000e+00 : f32
    %566 = vector.broadcast %cst_165 : f32 to vector<2x16xf32>
    %567 = arith.addf %566, %565 : vector<2x16xf32>
    %cst_166 = arith.constant 1.000000e+00 : f32
    %568 = vector.broadcast %cst_166 : f32 to vector<2x16xf32>
    %569 = arith.divf %568, %567 : vector<2x16xf32>
    %570 = vector.extract_strided_slice %553 {offsets = [0, 32], sizes = [2, 16], strides = [1, 1]} : vector<2x64xf32> to vector<2x16xf32>
    %571 = math.tanh %570 : vector<2x16xf32>
    %572 = vector.extract_strided_slice %553 {offsets = [0, 48], sizes = [2, 16], strides = [1, 1]} : vector<2x64xf32> to vector<2x16xf32>
    %cst_167 = arith.constant 0.000000e+00 : f32
    %573 = vector.broadcast %cst_167 : f32 to vector<2x16xf32>
    %574 = arith.subf %573, %572 : vector<2x16xf32>
    %575 = math.exp %574 : vector<2x16xf32>
    %cst_168 = arith.constant 1.000000e+00 : f32
    %576 = vector.broadcast %cst_168 : f32 to vector<2x16xf32>
    %577 = arith.addf %576, %575 : vector<2x16xf32>
    %cst_169 = arith.constant 1.000000e+00 : f32
    %578 = vector.broadcast %cst_169 : f32 to vector<2x16xf32>
    %579 = arith.divf %578, %577 : vector<2x16xf32>
    %580 = arith.mulf %569, %510 : vector<2x16xf32>
    %581 = arith.mulf %561, %571 : vector<2x16xf32>
    %582 = arith.addf %580, %581 : vector<2x16xf32>
    %583 = math.tanh %582 : vector<2x16xf32>
    %584 = arith.mulf %579, %583 : vector<2x16xf32>
    %585 = tpu.concatenate %80, %152, %224, %296, %368, %440, %512, %584 in 1 : vector<2x16xf32>, vector<2x16xf32>, vector<2x16xf32>, vector<2x16xf32>, vector<2x16xf32>, vector<2x16xf32>, vector<2x16xf32>, vector<2x16xf32> -> vector<2x128xf32>
    %c0_170 = arith.constant 0 : index
    %c0_171 = arith.constant 0 : index
    %586 = vector.load %arg2[%c0_170, %c0_171] : memref<2x128xf32, #tpu.memory_space<vmem>>, vector<2x128xf32>
    tpu.vector_store %arg2[%c0_170, %c0_171], %585 {strides = array<i32>} : memref<2x128xf32, #tpu.memory_space<vmem>>, vector<2x128xf32>,
    return
  }
}

</mosaic_0001>

<bundles_post_ra>
// kernel: tpu_custom_call.1
= control target key start
LH: loop header
LB: loop body
LE: loop exit
PB: predicated region body
PF: predicated region fallthrough
CT: control target
= control target key end

     0   :  { %v2383_v3 = vmov 0.0|0.0   ;;  %vm2384_vm0 = vmmov 0   ;;  %v2385_v6 = vmov 0.0   ;;  %s2815_s0 = inlined_call_operand.vmem [shape: f32[2,8,32], index: 0, kind: input, shape index: {}]   ;;  %s2816_s1 = inlined_call_operand.vmem [shape: f32[96,64], index: 1, kind: input, shape index: {}]   ;;  %s2817_s2 = inlined_call_operand.hbm [shape: f32[2,128], index: 2, kind: output, shape index: {}]  }
   0x1   :  { %v14_v0 = vld [vmem:[%s2816_s1] sm:$0xff]  ;;  %v15_v1 = vld [vmem:[%s2816_s1 + $0x8] sm:$0xff]  ;;  %v16_v2 = vld [vmem:[%s2816_s1 + $0x10] sm:$0xff]  ;;  %2098 = vmatprep.subr.bf16.mxu0 %v2383_v3  ;;  %1902 = vmatprep.mubr.msk.f32.mxu0 %vm2384_vm0, %v2385_v6 }
   0x2   :  { %v2419_v4 = vpack.c.bf16 %v15_v1, %v14_v0  ;;  %v17_v5 = vld [vmem:[%s2816_s1 + $0x18] sm:$0xff]  ;;  %v13_v7 = vld [vmem:[%s2815_s0 + $0x8] sm:$0xff]  ;;  %2107 = vmatprep.subr.bf16.mxu1 %v2383_v3  ;;  %1913 = vmatprep.mubr.msk.f32.mxu1 %vm2384_vm0, %v2385_v6 }
   0x3   :  { %v2433_v8 = vpack.c.bf16 %v17_v5, %v16_v2 }
   0x4   :  { %2100 = vmatpush3.bf16.msra.mxu0 %v2419_v4 }
   0x5   :  { %7 = vsyncpa [#allocation3], 0  ;;  %2101 = vmatprep.subr.bf16.mxu0 %v2383_v3  ;;  %v18_v9 = vld [vmem:[%s2816_s1 + $0x20] sm:$0xff]  ;;  %v19_v10 = vld [vmem:[%s2816_s1 + $0x28] sm:$0xff]  ;;  %v2442_v11 = vrot.slane %v13_v7, 7  ;;  %vm29_vm1 = vcmask 1041409  }
   0x6   :  { %v2447_v12 = vld [vmem:[%s2815_s0] sm:$0xff]  ;;  %v2450_v13 = vpack.c.bf16 %v19_v10, %v18_v9  ;;  %vm32_vm2 = vcmask 261120   ;;  %vm38_vm3 = vcmask 392192   ;;  %v2464_v16 = vld [vmem:[%s2816_s1 + $0x30] ss:$0 sm:$0xff]  ;;  %s2386_s27 = smov 96  }
   0x7   :  { %v30_v14 = vsel %vm29_vm1, %v2442_v11, %v2447_v12  ;;  %s2387_s28 = smov 16   ;;  %v21_v31 = vld [vmem:[%s2816_s1 + $0x38] sm:$0xff]  ;;  %v22_v32 = vld [vmem:[%s2816_s1 + $0x40] sm:$0xff]  ;;  %v23_v33 = vld [vmem:[%s2816_s1 + $0x48] sm:$0xff]  ;;  %s2388_s9 = smov 32   ;;  %vm140_vm4 = vcmask 130048  }
   0x8   :  { %2103 = vmatpush3.bf16.msra.mxu0 %v2433_v8  ;;  %v33_v15 = vsel %vm32_vm2, %v30_v14, 0.0  ;;  %v2481_v34 = vpack.c.bf16 %v22_v32, %v21_v31  ;;  %v24_v35 = vld [vmem:[%s2816_s1 + $0x50] sm:$0xff]  ;;  %s2389_s10 = smov 80   ;;  %s2390_s11 = smov 112   ;;  %vm243_vm5 = vcmask 1042434   ;;  %vm455_vm6 = vcmask 1043459  }
   0x9   :  { %2104 = vmatprep.subr.bf16.mxu0 %v2383_v3  ;;  %v2487_v36 = vpack.c.bf16 %v24_v35, %v23_v33  ;;  %v244_v43 = vsel %vm243_vm5, %v2442_v11, %v2447_v12  ;;  %v2522_v47 = vld [vmem:[%s2816_s1 + $0x58] ss:$0 sm:$0xff]  ;;  %vm667_vm7 = vcmask 1044484   ;;  %vm879_vm8 = vcmask 1045509   ;;  %s2392_s17 = smov 64   ;;  %s2393_s18 = smov [#allocation2]  }
   0xa   :  { %2109 = vmatpush3.bf16.msra.mxu1 %v2481_v34  ;;  %vm1091_vm9 = vcmask 1046534   ;;  %vm1303_vm10 = vcmask 1047559   ;;  %vm1525_vm11 = vcmask 1040384   ;;  %vm1753_vm12 = vcmask 523264   ;;  %s1768_s19 = sshll.u32 %s2393_s18, 4  ;;  %s1769_s19 = int_to_ptr.vmem [resolvable:$true] %s1768_s19 }
   0xb   :  { %2110 = vmatprep.subr.bf16.mxu1 %v2383_v3  ;;  %vm1755_vm13 = vcmask 654336   ;;  %vm1757_vm14 = vcmask 785408   ;;  %vm1759_vm15 = vcmask 916480   ;;  %s2359_s20 = scalar_lea.vmem %s1769_s19, 32  ;;  %p2364_p1 = scmp.lt.s32.totalorder %s1769_s19, %s1769_s19 }
   0xc   :  { %2106 = vmatpush3.bf16.msra.mxu0 %v2450_v13  ;;  %p2360_p0 = scmp.ne.s32.totalorder %s1769_s19, %s2359_s20  ;;  %p2365_p2 = scmp.lt.s32.totalorder %s2359_s20, %s2359_s20 }
   0xd   :  { %2122 = vmatprep.subr.bf16.mxu0 %v2383_v3 }
   0xe   :  { %2112 = vmatpush3.bf16.msra.mxu1 %v2487_v36  ;;  %p2366_p3 = por %p2365_p2, %p2364_p1 }
   0xf   :  { %1903 = vmatmul.mubr.msk.f32.vlgmr.msra.gmra.mrb[0].mxu0 %vm38_vm3, %v33_v15  ;;  %2113 = vmatprep.subr.bf16.mxu1 %v2383_v3 }
  0x10   :  { %1939 = vmatprep.mubr.msk.f32.mxu0 %vm2384_vm0, %v2385_v6  ;;  %2124 = vmatpush3.bf16.msra.mxu0 %v2481_v34  ;;  %p2367_p4 = pnand %p2366_p3, %p2360_p0 }
  0x11   :  { %2125 = vmatprep.subr.bf16.mxu0 %v2383_v3 }
  0x14   :  { %2127 = vmatpush3.bf16.msra.mxu0 %v2487_v36 }
  0x15   :  { %2128 = vmatprep.subr.bf16.mxu0 %v2383_v3 }
  0xe2   :  { %v108_v17 = vpop.f32.mrb[0].mxu0 }
  0xe3   :  { %v109_v18 = vadd.f32 %v2464_v16, %v108_v17  ;;  %v1904_v19 = vpop.f32.mrb[1].mxu0 }
  0xe5   :  { %2229 = vtanh.f32 %v109_v18  ;;  %v112_v21 = vsub.f32 0.0, %v109_v18 }
  0xe7   :  { %v113_v22 = vmul.f32 1.442695, %v112_v21 }
  0xe9   :  { %2231 = vpow2.f32 %v113_v22 }
  0xef   :  { %v2230_v20 = vpop.eup %2229 }
  0xf0   :  { %121 = vrot.lane.b32.xlu0 %v2230_v20, %s2386_s27 }
  0xf3   :  { %v2232_v23 = vpop.eup %2231 }
  0xf4   :  { %v115_v24 = vadd.f32 1.0, %v2232_v23 }
  0xf6   :  { %2233 = vrcp.f32 %v115_v24 }
 0x100   :  { %v2234_v25 = vpop.eup %2233 }
 0x101   :  { %v119_v28 = vmul.f32 0.0, %v2234_v25 }
 0x162   :  { %v122_v26 = vpop.permute.xlu0 %121 }
 0x163   :  { %v124_v27 = vmul.f32 %v2234_v25, %v122_v26 }
 0x165   :  { %126 = vrot.lane.b32.xlu0 %v124_v27, %s2387_s28 }
 0x1d7   :  { %v127_v29 = vpop.permute.xlu0 %126 }
 0x1d8   :  { %v2469_v30 = vadd.f32 %v127_v29, %v119_v28 }
 0x1da   :  { %2235 = vtanh.f32 %v2469_v30 }
 0x1e4   :  { %v2236_v37 = vpop.eup %2235 }
 0x1e5   :  { %132 = vrot.lane.b32.xlu1 %v2236_v37, %s2388_s9 }
 0x257   :  { %v133_v38 = vpop.permute.xlu1 %132 }
 0x258   :  { %v135_v39 = vmul.f32 %v2234_v25, %v133_v38 }
 0x25a   :  { %v246_v40 = vrot.slane %v135_v39, 7  ;;  %137 = vrot.lane.b32.xlu1 %v135_v39, %s2389_s10 }
 0x25c   :  { %247 = vrot.lane.b32.xlu0 %v246_v40, %s2390_s11 }
 0x2cc   :  { %v138_v41 = vpop.permute.xlu1 %137 }
 0x2cd   :  { %v141_v42 = vsel %vm140_vm4, %v138_v41, 0.0 }
 0x2ce   :  { %1914 = vmatmul.mubr.msk.f32.vlgmr.msra.gmra.mrb[0].mxu1 %vm32_vm2, %v141_v42  ;;  %v248_v44 = vpop.permute.xlu0 %247 }
 0x2cf   :  { %2115 = vmatpush3.bf16.msra.mxu1 %v2419_v4  ;;  %1928 = vmatprep.mubr.msk.f32.mxu1 %vm2384_vm0, %v2385_v6  ;;  %v250_v45 = vsel %vm32_vm2, %v244_v43, %v248_v44 }
 0x2d0   :  { %2116 = vmatprep.subr.bf16.mxu1 %v2383_v3  ;;  %v252_v46 = vrot.slane %v250_v45, 1 }
 0x2d3   :  { %2118 = vmatpush3.bf16.msra.mxu1 %v2433_v8 }
 0x2d4   :  { %2119 = vmatprep.subr.bf16.mxu1 %v2383_v3 }
 0x2d7   :  { %2121 = vmatpush3.bf16.msra.mxu1 %v2450_v13 }
 0x2d8   :  { %2137 = vmatprep.subr.bf16.mxu1 %v2383_v3 }
 0x2da   :  { %1929 = vmatmul.mubr.msk.f32.vlgmr.msra.gmra.mrb[2].mxu1 %vm38_vm3, %v252_v46 }
 0x2db   :  { %2139 = vmatpush3.bf16.msra.mxu1 %v2481_v34  ;;  %1965 = vmatprep.mubr.msk.f32.mxu1 %vm2384_vm0, %v2385_v6 }
 0x2dc   :  { %2140 = vmatprep.subr.bf16.mxu1 %v2383_v3 }
 0x2df   :  { %2142 = vmatpush3.bf16.msra.mxu1 %v2487_v36 }
 0x2e0   :  { %2143 = vmatprep.subr.bf16.mxu1 %v2383_v3 }
 0x3a1   :  { %v215_v48 = vpop.f32.mrb[0].mxu1 }
 0x3a2   :  { %v216_v49 = vadd.f32 %v2522_v47, %v215_v48  ;;  %v1915_v50 = vpop.f32.mrb[1].mxu1 }
 0x3a4   :  { %2237 = vtanh.f32 %v216_v49  ;;  %v219_v56 = vsub.f32 0.0, %v216_v49 }
 0x3a6   :  { %v220_v57 = vmul.f32 1.442695, %v219_v56 }
 0x3ad   :  { %v321_v51 = vpop.f32.mrb[2].mxu1 }
 0x3ae   :  { %v2238_v52 = vpop.eup %2237  ;;  %v322_v53 = vadd.f32 %v2464_v16, %v321_v51  ;;  %v1930_v54 = vpop.f32.mrb[3].mxu1 }
 0x3af   :  { %228 = vrot.lane.b32.xlu1 %v2238_v52, %s2386_s27 }
 0x3b0   :  { %2239 = vtanh.f32 %v322_v53  ;;  %v325_v58 = vsub.f32 0.0, %v322_v53 }
 0x3b1   :  { %2241 = vpow2.f32 %v220_v57 }
 0x3b2   :  { %v326_v59 = vmul.f32 1.442695, %v325_v58 }
 0x3b4   :  { %2243 = vpow2.f32 %v326_v59 }
 0x3ba   :  { %v2240_v55 = vpop.eup %2239 }
 0x3bb   :  { %334 = vrot.lane.b32.xlu0 %v2240_v55, %s2386_s27  ;;  %v2242_v60 = vpop.eup %2241 }
 0x3bc   :  { %v222_v61 = vadd.f32 1.0, %v2242_v60 }
 0x3be   :  { %2245 = vrcp.f32 %v222_v61  ;;  %v2244_v62 = vpop.eup %2243 }
 0x3bf   :  { %v328_v63 = vadd.f32 1.0, %v2244_v62 }
 0x3c1   :  { %2247 = vrcp.f32 %v328_v63 }
 0x3c8   :  { %v2246_v0 = vpop.eup %2245 }
 0x3c9   :  { %v226_v10 = vmul.f32 0.0, %v2246_v0 }
 0x3cb   :  { %v2248_v5 = vpop.eup %2247 }
 0x3cc   :  { %v332_v17 = vmul.f32 %v2248_v5, %v2469_v30  ;;  %v456_v30 = vsel %vm455_vm6, %v2442_v11, %v2447_v12 }
 0x421   :  { %v229_v1 = vpop.permute.xlu1 %228 }
 0x422   :  { %v231_v2 = vmul.f32 %v2246_v0, %v229_v1 }
 0x424   :  { %233 = vrot.lane.b32.xlu1 %v231_v2, %s2387_s28 }
 0x42d   :  { %v335_v7 = vpop.permute.xlu0 %334 }
 0x42e   :  { %v337_v9 = vmul.f32 %v2248_v5, %v335_v7 }
 0x430   :  { %339 = vrot.lane.b32.xlu0 %v337_v9, %s2387_s28 }
 0x496   :  { %v234_v14 = vpop.permute.xlu1 %233 }
 0x497   :  { %v2530_v15 = vadd.f32 %v234_v14, %v226_v10 }
 0x499   :  { %2249 = vtanh.f32 %v2530_v15 }
 0x4a2   :  { %v340_v18 = vpop.permute.xlu0 %339 }
 0x4a3   :  { %v2250_v19 = vpop.eup %2249  ;;  %v2534_v20 = vadd.f32 %v340_v18, %v332_v17 }
 0x4a4   :  { %239 = vrot.lane.b32.xlu1 %v2250_v19, %s2388_s9  ;;  %v668_v19 = vsel %vm667_vm7, %v2442_v11, %v2447_v12 }
 0x4a5   :  { %2251 = vtanh.f32 %v2534_v20 }
 0x4af   :  { %v2252_v21 = vpop.eup %2251 }
 0x4b0   :  { %345 = vrot.lane.b32.xlu0 %v2252_v21, %s2388_s9 }
 0x516   :  { %v240_v22 = vpop.permute.xlu1 %239 }
 0x517   :  { %v2539_v23 = vmul.f32 %v2246_v0, %v240_v22 }
 0x519   :  { %354 = vrot.lane.b32.xlu0 %v2539_v23, %s2386_s27 }
 0x522   :  { %v346_v24 = vpop.permute.xlu0 %345 }
 0x523   :  { %v348_v25 = vmul.f32 %v2248_v5, %v346_v24 }
 0x525   :  { %350 = vrot.lane.b32.xlu1 %v348_v25, %s2389_s10  ;;  %v458_v26 = vrot.slane %v348_v25, 6 }
 0x529   :  { %459 = vrot.lane.b32.xlu1 %v458_v26, %s2390_s11 }
 0x58b   :  { %v355_v27 = vpop.permute.xlu0 %354 }
 0x597   :  { %v351_v28 = vpop.permute.xlu1 %350 }
 0x598   :  { %v357_v29 = vsel %vm140_vm4, %v351_v28, %v355_v27 }
 0x599   :  { %1940 = vmatmul.mubr.msk.f32.vlgmr.msra.gmra.mrb[2].mxu0 %vm32_vm2, %v357_v29 }
 0x59a   :  { %2130 = vmatpush3.bf16.msra.mxu0 %v2419_v4  ;;  %1954 = vmatprep.mubr.msk.f32.mxu0 %vm2384_vm0, %v2385_v6 }
 0x59b   :  { %2131 = vmatprep.subr.bf16.mxu0 %v2383_v3  ;;  %v460_v31 = vpop.permute.xlu1 %459 }
 0x59c   :  { %v462_v32 = vsel %vm32_vm2, %v456_v30, %v460_v31 }
 0x59d   :  { %v464_v33 = vrot.slane %v462_v32, 2 }
 0x59e   :  { %2133 = vmatpush3.bf16.msra.mxu0 %v2433_v8 }
 0x59f   :  { %2134 = vmatprep.subr.bf16.mxu0 %v2383_v3 }
 0x5a2   :  { %2136 = vmatpush3.bf16.msra.mxu0 %v2450_v13 }
 0x5a3   :  { %2152 = vmatprep.subr.bf16.mxu0 %v2383_v3 }
 0x5a5   :  { %1955 = vmatmul.mubr.msk.f32.vlgmr.msra.gmra.mrb[4].mxu0 %vm38_vm3, %v464_v33 }
 0x5a6   :  { %2154 = vmatpush3.bf16.msra.mxu0 %v2481_v34  ;;  %1991 = vmatprep.mubr.msk.f32.mxu0 %vm2384_vm0, %v2385_v6 }
 0x5a7   :  { %2155 = vmatprep.subr.bf16.mxu0 %v2383_v3 }
 0x5aa   :  { %2157 = vmatpush3.bf16.msra.mxu0 %v2487_v36 }
 0x5ab   :  { %2158 = vmatprep.subr.bf16.mxu0 %v2383_v3 }
 0x66c   :  { %v427_v35 = vpop.f32.mrb[2].mxu0 }
 0x66d   :  { %v428_v37 = vadd.f32 %v2522_v47, %v427_v35  ;;  %v1941_v38 = vpop.f32.mrb[3].mxu0 }
 0x66f   :  { %2253 = vtanh.f32 %v428_v37  ;;  %v431_v44 = vsub.f32 0.0, %v428_v37 }
 0x671   :  { %v432_v45 = vmul.f32 1.442695, %v431_v44 }
 0x678   :  { %v533_v39 = vpop.f32.mrb[4].mxu0 }
 0x679   :  { %v2254_v40 = vpop.eup %2253  ;;  %v534_v41 = vadd.f32 %v2464_v16, %v533_v39  ;;  %v1956_v42 = vpop.f32.mrb[5].mxu0 }
 0x67a   :  { %440 = vrot.lane.b32.xlu0 %v2254_v40, %s2386_s27 }
 0x67b   :  { %2255 = vtanh.f32 %v534_v41  ;;  %v537_v46 = vsub.f32 0.0, %v534_v41 }
 0x67c   :  { %2257 = vpow2.f32 %v432_v45 }
 0x67d   :  { %v538_v48 = vmul.f32 1.442695, %v537_v46 }
 0x67f   :  { %2259 = vpow2.f32 %v538_v48 }
 0x685   :  { %v2256_v43 = vpop.eup %2255 }
 0x686   :  { %546 = vrot.lane.b32.xlu1 %v2256_v43, %s2386_s27  ;;  %v2258_v49 = vpop.eup %2257 }
 0x687   :  { %v434_v50 = vadd.f32 1.0, %v2258_v49 }
 0x689   :  { %2261 = vrcp.f32 %v434_v50  ;;  %v2260_v51 = vpop.eup %2259 }
 0x68a   :  { %v540_v52 = vadd.f32 1.0, %v2260_v51 }
 0x68c   :  { %2263 = vrcp.f32 %v540_v52 }
 0x693   :  { %v2262_v53 = vpop.eup %2261 }
 0x694   :  { %v438_v59 = vmul.f32 %v2262_v53, %v2530_v15 }
 0x696   :  { %v2264_v56 = vpop.eup %2263 }
 0x697   :  { %v544_v62 = vmul.f32 %v2264_v56, %v2534_v20 }
 0x6ec   :  { %v441_v54 = vpop.permute.xlu0 %440 }
 0x6ed   :  { %v443_v55 = vmul.f32 %v2262_v53, %v441_v54 }
 0x6ef   :  { %445 = vrot.lane.b32.xlu0 %v443_v55, %s2387_s28 }
 0x6f8   :  { %v547_v57 = vpop.permute.xlu1 %546 }
 0x6f9   :  { %v549_v58 = vmul.f32 %v2264_v56, %v547_v57 }
 0x6fb   :  { %551 = vrot.lane.b32.xlu1 %v549_v58, %s2387_s28 }
 0x761   :  { %v446_v60 = vpop.permute.xlu0 %445 }
 0x762   :  { %v2572_v61 = vadd.f32 %v446_v60, %v438_v59 }
 0x764   :  { %2265 = vtanh.f32 %v2572_v61 }
 0x76d   :  { %v552_v63 = vpop.permute.xlu1 %551 }
 0x76e   :  { %v2266_v0 = vpop.eup %2265  ;;  %v2576_v1 = vadd.f32 %v552_v63, %v544_v62 }
 0x76f   :  { %451 = vrot.lane.b32.xlu0 %v2266_v0, %s2388_s9 }
 0x770   :  { %2267 = vtanh.f32 %v2576_v1 }
 0x77a   :  { %v2268_v2 = vpop.eup %2267 }
 0x77b   :  { %557 = vrot.lane.b32.xlu1 %v2268_v2, %s2388_s9 }
 0x7e1   :  { %v452_v5 = vpop.permute.xlu0 %451 }
 0x7e2   :  { %v454_v7 = vmul.f32 %v2262_v53, %v452_v5 }
 0x7e4   :  { %566 = vrot.lane.b32.xlu1 %v454_v7, %s2386_s27 }
 0x7ed   :  { %v558_v9 = vpop.permute.xlu1 %557 }
 0x7ee   :  { %v560_v10 = vmul.f32 %v2264_v56, %v558_v9 }
 0x7f0   :  { %562 = vrot.lane.b32.xlu0 %v560_v10, %s2389_s10  ;;  %v670_v14 = vrot.slane %v560_v10, 5 }
 0x7f4   :  { %671 = vrot.lane.b32.xlu0 %v670_v14, %s2390_s11 }
 0x856   :  { %v2584_v15 = vpop.permute.xlu1 %566 }
 0x862   :  { %v563_v17 = vpop.permute.xlu0 %562 }
 0x863   :  { %v569_v18 = vsel %vm140_vm4, %v563_v17, %v2584_v15 }
 0x864   :  { %1966 = vmatmul.mubr.msk.f32.vlgmr.msra.gmra.mrb[4].mxu1 %vm32_vm2, %v569_v18 }
 0x865   :  { %2145 = vmatpush3.bf16.msra.mxu1 %v2419_v4  ;;  %1980 = vmatprep.mubr.msk.f32.mxu1 %vm2384_vm0, %v2385_v6 }
 0x866   :  { %2146 = vmatprep.subr.bf16.mxu1 %v2383_v3  ;;  %v672_v20 = vpop.permute.xlu0 %671 }
 0x867   :  { %v674_v21 = vsel %vm32_vm2, %v668_v19, %v672_v20 }
 0x868   :  { %v676_v22 = vrot.slane %v674_v21, 3 }
 0x869   :  { %2148 = vmatpush3.bf16.msra.mxu1 %v2433_v8 }
 0x86a   :  { %2149 = vmatprep.subr.bf16.mxu1 %v2383_v3 }
 0x86d   :  { %2151 = vmatpush3.bf16.msra.mxu1 %v2450_v13 }
 0x86e   :  { %2167 = vmatprep.subr.bf16.mxu1 %v2383_v3 }
 0x870   :  { %1981 = vmatmul.mubr.msk.f32.vlgmr.msra.gmra.mrb[6].mxu1 %vm38_vm3, %v676_v22 }
 0x871   :  { %2169 = vmatpush3.bf16.msra.mxu1 %v2481_v34  ;;  %2017 = vmatprep.mubr.msk.f32.mxu1 %vm2384_vm0, %v2385_v6 }
 0x872   :  { %2170 = vmatprep.subr.bf16.mxu1 %v2383_v3 }
 0x875   :  { %2172 = vmatpush3.bf16.msra.mxu1 %v2487_v36 }
 0x876   :  { %2173 = vmatprep.subr.bf16.mxu1 %v2383_v3 }
 0x937   :  { %v639_v24 = vpop.f32.mrb[4].mxu1 }
 0x938   :  { %v640_v25 = vadd.f32 %v2522_v47, %v639_v24  ;;  %v1967_v26 = vpop.f32.mrb[5].mxu1 }
 0x93a   :  { %2269 = vtanh.f32 %v640_v25  ;;  %v643_v32 = vsub.f32 0.0, %v640_v25 }
 0x93c   :  { %v644_v33 = vmul.f32 1.442695, %v643_v32 }
 0x943   :  { %v745_v27 = vpop.f32.mrb[6].mxu1 }
 0x944   :  { %v2270_v28 = vpop.eup %2269  ;;  %v746_v29 = vadd.f32 %v2464_v16, %v745_v27  ;;  %v1982_v30 = vpop.f32.mrb[7].mxu1 }
 0x945   :  { %652 = vrot.lane.b32.xlu1 %v2270_v28, %s2386_s27 }
 0x946   :  { %2271 = vtanh.f32 %v746_v29  ;;  %v749_v35 = vsub.f32 0.0, %v746_v29 }
 0x947   :  { %2273 = vpow2.f32 %v644_v33 }
 0x948   :  { %v750_v37 = vmul.f32 1.442695, %v749_v35 }
 0x94a   :  { %2275 = vpow2.f32 %v750_v37 }
 0x950   :  { %v2272_v31 = vpop.eup %2271 }
 0x951   :  { %758 = vrot.lane.b32.xlu0 %v2272_v31, %s2386_s27  ;;  %v2274_v38 = vpop.eup %2273 }
 0x952   :  { %v646_v39 = vadd.f32 1.0, %v2274_v38 }
 0x954   :  { %2277 = vrcp.f32 %v646_v39  ;;  %v2276_v40 = vpop.eup %2275 }
 0x955   :  { %v752_v41 = vadd.f32 1.0, %v2276_v40 }
 0x957   :  { %2279 = vrcp.f32 %v752_v41 }
 0x95e   :  { %v2278_v42 = vpop.eup %2277 }
 0x95f   :  { %v650_v49 = vmul.f32 %v2278_v42, %v2572_v61 }
 0x961   :  { %v2280_v45 = vpop.eup %2279 }
 0x962   :  { %v756_v52 = vmul.f32 %v2280_v45, %v2576_v1  ;;  %v880_v1 = vsel %vm879_vm8, %v2442_v11, %v2447_v12 }
 0x9b7   :  { %v653_v43 = vpop.permute.xlu1 %652 }
 0x9b8   :  { %v655_v44 = vmul.f32 %v2278_v42, %v653_v43 }
 0x9ba   :  { %657 = vrot.lane.b32.xlu1 %v655_v44, %s2387_s28 }
 0x9c3   :  { %v759_v46 = vpop.permute.xlu0 %758 }
 0x9c4   :  { %v761_v48 = vmul.f32 %v2280_v45, %v759_v46 }
 0x9c6   :  { %763 = vrot.lane.b32.xlu0 %v761_v48, %s2387_s28 }
 0xa2c   :  { %v658_v50 = vpop.permute.xlu1 %657 }
 0xa2d   :  { %v2614_v51 = vadd.f32 %v658_v50, %v650_v49 }
 0xa2f   :  { %2281 = vtanh.f32 %v2614_v51 }
 0xa38   :  { %v764_v53 = vpop.permute.xlu0 %763 }
 0xa39   :  { %v2282_v54 = vpop.eup %2281  ;;  %v2618_v55 = vadd.f32 %v764_v53, %v756_v52 }
 0xa3a   :  { %663 = vrot.lane.b32.xlu1 %v2282_v54, %s2388_s9 }
 0xa3b   :  { %2283 = vtanh.f32 %v2618_v55 }
 0xa45   :  { %v2284_v56 = vpop.eup %2283 }
 0xa46   :  { %769 = vrot.lane.b32.xlu0 %v2284_v56, %s2388_s9  ;;  %v1092_v56 = vsel %vm1091_vm9, %v2442_v11, %v2447_v12 }
 0xaac   :  { %v664_v57 = vpop.permute.xlu1 %663 }
 0xaad   :  { %v2623_v58 = vmul.f32 %v2278_v42, %v664_v57 }
 0xaaf   :  { %778 = vrot.lane.b32.xlu0 %v2623_v58, %s2386_s27 }
 0xab8   :  { %v770_v59 = vpop.permute.xlu0 %769 }
 0xab9   :  { %v772_v60 = vmul.f32 %v2280_v45, %v770_v59 }
 0xabb   :  { %774 = vrot.lane.b32.xlu1 %v772_v60, %s2389_s10  ;;  %v882_v61 = vrot.slane %v772_v60, 4 }
 0xabf   :  { %883 = vrot.lane.b32.xlu1 %v882_v61, %s2390_s11 }
 0xb21   :  { %v779_v62 = vpop.permute.xlu0 %778 }
 0xb2d   :  { %v775_v63 = vpop.permute.xlu1 %774 }
 0xb2e   :  { %v781_v0 = vsel %vm140_vm4, %v775_v63, %v779_v62 }
 0xb2f   :  { %1992 = vmatmul.mubr.msk.f32.vlgmr.msra.gmra.mrb[6].mxu0 %vm32_vm2, %v781_v0 }
 0xb30   :  { %2160 = vmatpush3.bf16.msra.mxu0 %v2419_v4  ;;  %2006 = vmatprep.mubr.msk.f32.mxu0 %vm2384_vm0, %v2385_v6 }
 0xb31   :  { %2161 = vmatprep.subr.bf16.mxu0 %v2383_v3  ;;  %v884_v2 = vpop.permute.xlu1 %883 }
 0xb32   :  { %v886_v5 = vsel %vm32_vm2, %v880_v1, %v884_v2 }
 0xb33   :  { %v888_v7 = vrot.slane %v886_v5, 4 }
 0xb34   :  { %2163 = vmatpush3.bf16.msra.mxu0 %v2433_v8 }
 0xb35   :  { %2164 = vmatprep.subr.bf16.mxu0 %v2383_v3 }
 0xb38   :  { %2166 = vmatpush3.bf16.msra.mxu0 %v2450_v13 }
 0xb39   :  { %2182 = vmatprep.subr.bf16.mxu0 %v2383_v3 }
 0xb3b   :  { %2007 = vmatmul.mubr.msk.f32.vlgmr.msra.gmra.mrb[8].mxu0 %vm38_vm3, %v888_v7 }
 0xb3c   :  { %2184 = vmatpush3.bf16.msra.mxu0 %v2481_v34  ;;  %2043 = vmatprep.mubr.msk.f32.mxu0 %vm2384_vm0, %v2385_v6 }
 0xb3d   :  { %2185 = vmatprep.subr.bf16.mxu0 %v2383_v3 }
 0xb40   :  { %2187 = vmatpush3.bf16.msra.mxu0 %v2487_v36 }
 0xb41   :  { %2188 = vmatprep.subr.bf16.mxu0 %v2383_v3 }
 0xc02   :  { %v851_v9 = vpop.f32.mrb[6].mxu0 }
 0xc03   :  { %v852_v10 = vadd.f32 %v2522_v47, %v851_v9  ;;  %v1993_v14 = vpop.f32.mrb[7].mxu0 }
 0xc05   :  { %2285 = vtanh.f32 %v852_v10  ;;  %v855_v22 = vsub.f32 0.0, %v852_v10 }
 0xc07   :  { %v856_v24 = vmul.f32 1.442695, %v855_v22 }
 0xc0e   :  { %v957_v17 = vpop.f32.mrb[8].mxu0 }
 0xc0f   :  { %v2286_v18 = vpop.eup %2285  ;;  %v958_v19 = vadd.f32 %v2464_v16, %v957_v17  ;;  %v2008_v20 = vpop.f32.mrb[9].mxu0 }
 0xc10   :  { %864 = vrot.lane.b32.xlu0 %v2286_v18, %s2386_s27 }
 0xc11   :  { %2287 = vtanh.f32 %v958_v19  ;;  %v961_v25 = vsub.f32 0.0, %v958_v19 }
 0xc12   :  { %2289 = vpow2.f32 %v856_v24 }
 0xc13   :  { %v962_v26 = vmul.f32 1.442695, %v961_v25 }
 0xc15   :  { %2291 = vpow2.f32 %v962_v26 }
 0xc1b   :  { %v2288_v21 = vpop.eup %2287 }
 0xc1c   :  { %970 = vrot.lane.b32.xlu1 %v2288_v21, %s2386_s27  ;;  %v2290_v27 = vpop.eup %2289 }
 0xc1d   :  { %v858_v28 = vadd.f32 1.0, %v2290_v27 }
 0xc1f   :  { %2293 = vrcp.f32 %v858_v28  ;;  %v2292_v29 = vpop.eup %2291 }
 0xc20   :  { %v964_v30 = vadd.f32 1.0, %v2292_v29 }
 0xc22   :  { %2295 = vrcp.f32 %v964_v30 }
 0xc29   :  { %v2294_v31 = vpop.eup %2293 }
 0xc2a   :  { %v862_v39 = vmul.f32 %v2294_v31, %v2614_v51 }
 0xc2c   :  { %v2296_v35 = vpop.eup %2295 }
 0xc2d   :  { %v968_v42 = vmul.f32 %v2296_v35, %v2618_v55 }
 0xc82   :  { %v865_v32 = vpop.permute.xlu0 %864 }
 0xc83   :  { %v867_v33 = vmul.f32 %v2294_v31, %v865_v32 }
 0xc85   :  { %869 = vrot.lane.b32.xlu0 %v867_v33, %s2387_s28 }
 0xc8e   :  { %v971_v37 = vpop.permute.xlu1 %970 }
 0xc8f   :  { %v973_v38 = vmul.f32 %v2296_v35, %v971_v37 }
 0xc91   :  { %975 = vrot.lane.b32.xlu1 %v973_v38, %s2387_s28 }
 0xcf7   :  { %v870_v40 = vpop.permute.xlu0 %869 }
 0xcf8   :  { %v2656_v41 = vadd.f32 %v870_v40, %v862_v39 }
 0xcfa   :  { %2297 = vtanh.f32 %v2656_v41 }
 0xd03   :  { %v976_v43 = vpop.permute.xlu1 %975 }
 0xd04   :  { %v2298_v44 = vpop.eup %2297  ;;  %v2660_v45 = vadd.f32 %v976_v43, %v968_v42 }
 0xd05   :  { %875 = vrot.lane.b32.xlu0 %v2298_v44, %s2388_s9 }
 0xd06   :  { %2299 = vtanh.f32 %v2660_v45 }
 0xd10   :  { %v2300_v46 = vpop.eup %2299 }
 0xd11   :  { %981 = vrot.lane.b32.xlu1 %v2300_v46, %s2388_s9 }
 0xd77   :  { %v876_v48 = vpop.permute.xlu0 %875 }
 0xd78   :  { %v2665_v49 = vmul.f32 %v2294_v31, %v876_v48  ;;  %v1304_v48 = vsel %vm1303_vm10, %v2442_v11, %v2447_v12 }
 0xd7a   :  { %990 = vrot.lane.b32.xlu1 %v2665_v49, %s2386_s27 }
 0xd83   :  { %v982_v50 = vpop.permute.xlu1 %981 }
 0xd84   :  { %v984_v51 = vmul.f32 %v2296_v35, %v982_v50 }
 0xd86   :  { %986 = vrot.lane.b32.xlu0 %v984_v51, %s2389_s10  ;;  %v1094_v52 = vrot.slane %v984_v51, 3 }
 0xd8a   :  { %1095 = vrot.lane.b32.xlu0 %v1094_v52, %s2390_s11 }
 0xdec   :  { %v991_v53 = vpop.permute.xlu1 %990 }
 0xdf8   :  { %v987_v54 = vpop.permute.xlu0 %986 }
 0xdf9   :  { %v993_v55 = vsel %vm140_vm4, %v987_v54, %v991_v53 }
 0xdfa   :  { %2018 = vmatmul.mubr.msk.f32.vlgmr.msra.gmra.mrb[8].mxu1 %vm32_vm2, %v993_v55 }
 0xdfb   :  { %2175 = vmatpush3.bf16.msra.mxu1 %v2419_v4  ;;  %2032 = vmatprep.mubr.msk.f32.mxu1 %vm2384_vm0, %v2385_v6 }
 0xdfc   :  { %2176 = vmatprep.subr.bf16.mxu1 %v2383_v3  ;;  %v1096_v57 = vpop.permute.xlu0 %1095 }
 0xdfd   :  { %v1098_v59 = vsel %vm32_vm2, %v1092_v56, %v1096_v57 }
 0xdfe   :  { %v1100_v60 = vrot.slane %v1098_v59, 5 }
 0xdff   :  { %2178 = vmatpush3.bf16.msra.mxu1 %v2433_v8 }
 0xe00   :  { %2179 = vmatprep.subr.bf16.mxu1 %v2383_v3 }
 0xe03   :  { %2181 = vmatpush3.bf16.msra.mxu1 %v2450_v13 }
 0xe04   :  { %2197 = vmatprep.subr.bf16.mxu1 %v2383_v3 }
 0xe06   :  { %2033 = vmatmul.mubr.msk.f32.vlgmr.msra.gmra.mrb[10].mxu1 %vm38_vm3, %v1100_v60 }
 0xe07   :  { %2199 = vmatpush3.bf16.msra.mxu1 %v2481_v34  ;;  %2069 = vmatprep.mubr.msk.f32.mxu1 %vm2384_vm0, %v2385_v6 }
 0xe08   :  { %2200 = vmatprep.subr.bf16.mxu1 %v2383_v3 }
 0xe0b   :  { %2202 = vmatpush3.bf16.msra.mxu1 %v2487_v36 }
 0xe0c   :  { %2203 = vmatprep.subr.bf16.mxu1 %v2383_v3 }
 0xecd   :  { %v1063_v61 = vpop.f32.mrb[8].mxu1 }
 0xece   :  { %v1064_v62 = vadd.f32 %v2522_v47, %v1063_v61  ;;  %v2019_v63 = vpop.f32.mrb[9].mxu1 }
 0xed0   :  { %2301 = vtanh.f32 %v1064_v62  ;;  %v1067_v9 = vsub.f32 0.0, %v1064_v62 }
 0xed2   :  { %v1068_v10 = vmul.f32 1.442695, %v1067_v9 }
 0xed9   :  { %v1169_v0 = vpop.f32.mrb[10].mxu1 }
 0xeda   :  { %v2302_v1 = vpop.eup %2301  ;;  %v1170_v2 = vadd.f32 %v2464_v16, %v1169_v0  ;;  %v2034_v5 = vpop.f32.mrb[11].mxu1 }
 0xedb   :  { %1076 = vrot.lane.b32.xlu1 %v2302_v1, %s2386_s27 }
 0xedc   :  { %2303 = vtanh.f32 %v1170_v2  ;;  %v1173_v14 = vsub.f32 0.0, %v1170_v2 }
 0xedd   :  { %2305 = vpow2.f32 %v1068_v10 }
 0xede   :  { %v1174_v17 = vmul.f32 1.442695, %v1173_v14 }
 0xee0   :  { %2307 = vpow2.f32 %v1174_v17 }
 0xee6   :  { %v2304_v7 = vpop.eup %2303 }
 0xee7   :  { %1182 = vrot.lane.b32.xlu0 %v2304_v7, %s2386_s27  ;;  %v2306_v18 = vpop.eup %2305 }
 0xee8   :  { %v1070_v19 = vadd.f32 1.0, %v2306_v18 }
 0xeea   :  { %2309 = vrcp.f32 %v1070_v19  ;;  %v2308_v20 = vpop.eup %2307 }
 0xeeb   :  { %v1176_v21 = vadd.f32 1.0, %v2308_v20 }
 0xeed   :  { %2311 = vrcp.f32 %v1176_v21 }
 0xef4   :  { %v2310_v22 = vpop.eup %2309 }
 0xef5   :  { %v1074_v29 = vmul.f32 %v2310_v22, %v2656_v41 }
 0xef7   :  { %v2312_v26 = vpop.eup %2311 }
 0xef8   :  { %v1180_v32 = vmul.f32 %v2312_v26, %v2660_v45 }
 0xf4d   :  { %v1077_v24 = vpop.permute.xlu1 %1076 }
 0xf4e   :  { %v1079_v25 = vmul.f32 %v2310_v22, %v1077_v24 }
 0xf50   :  { %1081 = vrot.lane.b32.xlu1 %v1079_v25, %s2387_s28 }
 0xf59   :  { %v1183_v27 = vpop.permute.xlu0 %1182 }
 0xf5a   :  { %v1185_v28 = vmul.f32 %v2312_v26, %v1183_v27 }
 0xf5c   :  { %1187 = vrot.lane.b32.xlu0 %v1185_v28, %s2387_s28 }
 0xfc2   :  { %v1082_v30 = vpop.permute.xlu1 %1081 }
 0xfc3   :  { %v2698_v31 = vadd.f32 %v1082_v30, %v1074_v29 }
 0xfc5   :  { %2313 = vtanh.f32 %v2698_v31 }
 0xfce   :  { %v1188_v33 = vpop.permute.xlu0 %1187 }
 0xfcf   :  { %v2314_v35 = vpop.eup %2313  ;;  %v2702_v37 = vadd.f32 %v1188_v33, %v1180_v32 }
 0xfd0   :  { %1087 = vrot.lane.b32.xlu1 %v2314_v35, %s2388_s9 }
 0xfd1   :  { %2315 = vtanh.f32 %v2702_v37 }
 0xfdb   :  { %v2316_v38 = vpop.eup %2315 }
 0xfdc   :  { %1193 = vrot.lane.b32.xlu0 %v2316_v38, %s2388_s9 }
0x1042   :  { %v1088_v39 = vpop.permute.xlu1 %1087 }
0x1043   :  { %v2707_v40 = vmul.f32 %v2310_v22, %v1088_v39 }
0x1045   :  { %1202 = vrot.lane.b32.xlu0 %v2707_v40, %s2386_s27 }
0x104e   :  { %v1194_v41 = vpop.permute.xlu0 %1193 }
0x104f   :  { %v1196_v42 = vmul.f32 %v2312_v26, %v1194_v41 }
0x1051   :  { %1198 = vrot.lane.b32.xlu1 %v1196_v42, %s2389_s10  ;;  %v1306_v43 = vrot.slane %v1196_v42, 2 }
0x1055   :  { %1307 = vrot.lane.b32.xlu1 %v1306_v43, %s2390_s11 }
0x10b7   :  { %v1203_v44 = vpop.permute.xlu0 %1202 }
0x10c3   :  { %v1199_v45 = vpop.permute.xlu1 %1198 }
0x10c4   :  { %v1205_v46 = vsel %vm140_vm4, %v1199_v45, %v1203_v44 }
0x10c5   :  { %2044 = vmatmul.mubr.msk.f32.vlgmr.msra.gmra.mrb[10].mxu0 %vm32_vm2, %v1205_v46 }
0x10c6   :  { %2190 = vmatpush3.bf16.msra.mxu0 %v2419_v4  ;;  %2058 = vmatprep.mubr.msk.f32.mxu0 %vm2384_vm0, %v2385_v6 }
0x10c7   :  { %2191 = vmatprep.subr.bf16.mxu0 %v2383_v3  ;;  %v1308_v50 = vpop.permute.xlu1 %1307 }
0x10c8   :  { %v1310_v51 = vsel %vm32_vm2, %v1304_v48, %v1308_v50 }
0x10c9   :  { %v1312_v52 = vrot.slane %v1310_v51, 6 }
0x10ca   :  { %2193 = vmatpush3.bf16.msra.mxu0 %v2433_v8 }
0x10cb   :  { %2194 = vmatprep.subr.bf16.mxu0 %v2383_v3 }
0x10ce   :  { %2196 = vmatpush3.bf16.msra.mxu0 %v2450_v13 }
0x10cf   :  { %2212 = vmatprep.subr.bf16.mxu0 %v2383_v3 }
0x10d1   :  { %2059 = vmatmul.mubr.msk.f32.vlgmr.msra.gmra.mrb[12].mxu0 %vm38_vm3, %v1312_v52 }
0x10d2   :  { %2214 = vmatpush3.bf16.msra.mxu0 %v2481_v34  ;;  %2095 = vmatprep.mubr.msk.f32.mxu0 %vm2384_vm0, %v2385_v6 }
0x10d3   :  { %2215 = vmatprep.subr.bf16.mxu0 %v2383_v3 }
0x10d6   :  { %2217 = vmatpush3.bf16.msra.mxu0 %v2487_v36 }
0x1198   :  { %v1275_v12 = vpop.f32.mrb[10].mxu0 }
0x1199   :  { %v1276_v53 = vadd.f32 %v2522_v47, %v1275_v12  ;;  %v2045_v54 = vpop.f32.mrb[11].mxu0 }
0x119b   :  { %2317 = vtanh.f32 %v1276_v53  ;;  %v1279_v60 = vsub.f32 0.0, %v1276_v53 }
0x119d   :  { %v1280_v61 = vmul.f32 1.442695, %v1279_v60 }
0x11a4   :  { %v1381_v55 = vpop.f32.mrb[12].mxu0 }
0x11a5   :  { %v2318_v56 = vpop.eup %2317  ;;  %v1382_v57 = vadd.f32 %v2464_v16, %v1381_v55  ;;  %v2060_v59 = vpop.f32.mrb[13].mxu0 }
0x11a6   :  { %1288 = vrot.lane.b32.xlu0 %v2318_v56, %s2386_s27 }
0x11a7   :  { %2319 = vtanh.f32 %v1382_v57  ;;  %v1385_v36 = vsub.f32 0.0, %v1382_v57 }
0x11a8   :  { %2321 = vpow2.f32 %v1280_v61 }
0x11a9   :  { %v1386_v62 = vmul.f32 1.442695, %v1385_v36 }
0x11ab   :  { %2323 = vpow2.f32 %v1386_v62 }
0x11b1   :  { %v2320_v34 = vpop.eup %2319 }
0x11b2   :  { %1394 = vrot.lane.b32.xlu1 %v2320_v34, %s2386_s27  ;;  %v2322_v63 = vpop.eup %2321 }
0x11b3   :  { %v1282_v0 = vadd.f32 1.0, %v2322_v63 }
0x11b5   :  { %2325 = vrcp.f32 %v1282_v0  ;;  %v2324_v1 = vpop.eup %2323 }
0x11b6   :  { %v1388_v2 = vadd.f32 1.0, %v2324_v1 }
0x11b8   :  { %2327 = vrcp.f32 %v1388_v2 }
0x11bf   :  { %v2326_v5 = vpop.eup %2325 }
0x11c0   :  { %v1286_v17 = vmul.f32 %v2326_v5, %v2698_v31 }
0x11c2   :  { %v2328_v9 = vpop.eup %2327 }
0x11c3   :  { %v1392_v20 = vmul.f32 %v2328_v9, %v2702_v37  ;;  %v2357_v37 = vld [vmem:[%s2815_s0] sm:$0xff] }
0x1218   :  { %v1289_v16 = vpop.permute.xlu0 %1288 }
0x1219   :  { %v1291_v7 = vmul.f32 %v2326_v5, %v1289_v16 }
0x121b   :  { %1293 = vrot.lane.b32.xlu0 %v1291_v7, %s2387_s28 }
0x1224   :  { %v1395_v10 = vpop.permute.xlu1 %1394 }
0x1225   :  { %v1397_v14 = vmul.f32 %v2328_v9, %v1395_v10 }
0x1227   :  { %1399 = vrot.lane.b32.xlu1 %v1397_v14, %s2387_s28 }
0x128d   :  { %v1294_v18 = vpop.permute.xlu0 %1293 }
0x128e   :  { %v2739_v19 = vadd.f32 %v1294_v18, %v1286_v17 }
0x1290   :  { %2329 = vtanh.f32 %v2739_v19 }
0x1299   :  { %v1400_v21 = vpop.permute.xlu1 %1399 }
0x129a   :  { %v2330_v22 = vpop.eup %2329  ;;  %v2743_v24 = vadd.f32 %v1400_v21, %v1392_v20 }
0x129b   :  { %1299 = vrot.lane.b32.xlu0 %v2330_v22, %s2388_s9 }
0x129c   :  { %2331 = vtanh.f32 %v2743_v24 }
0x12a6   :  { %v2332_v25 = vpop.eup %2331 }
0x12a7   :  { %1405 = vrot.lane.b32.xlu1 %v2332_v25, %s2388_s9 }
0x130d   :  { %v1300_v26 = vpop.permute.xlu0 %1299 }
0x130e   :  { %v2748_v27 = vmul.f32 %v2326_v5, %v1300_v26 }
0x1310   :  { %1414 = vrot.lane.b32.xlu1 %v2748_v27, %s2386_s27 }
0x1319   :  { %v1406_v28 = vpop.permute.xlu1 %1405 }
0x131a   :  { %v1408_v29 = vmul.f32 %v2328_v9, %v1406_v28 }
0x131c   :  { %1410 = vrot.lane.b32.xlu0 %v1408_v29, %s2389_s10  ;;  %v1517_v30 = vrot.slane %v1408_v29, 1 }
0x1320   :  { %1518 = vrot.lane.b32.xlu0 %v1517_v30, %s2390_s11 }
0x1382   :  { %v1415_v31 = vpop.permute.xlu1 %1414 }
0x138e   :  { %v1411_v32 = vpop.permute.xlu0 %1410 }
0x138f   :  { %v1417_v33 = vsel %vm140_vm4, %v1411_v32, %v1415_v31 }
0x1390   :  { %2070 = vmatmul.mubr.msk.f32.vlgmr.msra.gmra.mrb[12].mxu1 %vm32_vm2, %v1417_v33 }
0x1391   :  { %2205 = vmatpush3.bf16.msra.mxu1 %v2419_v4  ;;  %2084 = vmatprep.mubr.msk.f32.mxu1 %vm2384_vm0, %v2385_v6 }
0x1392   :  { %v1519_v35 = vpop.permute.xlu0 %1518  ;;  %2206 = vmatprep.subr.bf16.mxu1 %v2383_v3 }
0x1393   :  { %v1521_v38 = vsel %vm32_vm2, %v2357_v37, %v1519_v35  ;;  %v1522_v39 = vsel %vm32_vm2, %v2442_v11, %v1519_v35 }
0x1394   :  { %v1526_v4 = vrot.slane %v1521_v38, 7  ;;  %v1527_v41 = vrot.slane %v1522_v39, 7 }
0x1395   :  { %2208 = vmatpush3.bf16.msra.mxu1 %v2433_v8  ;;  %v2358_v8 = vld [vmem:[%s2816_s1 + $0x30] ss:$0 sm:$0xff]  ;;  %s2391_s1 = smov 48  }
0x1396   :  { %2209 = vmatprep.subr.bf16.mxu1 %v2383_v3  ;;  %v1528_v6 = vsel %vm1525_vm11, %v1526_v4, %v1527_v41 }
0x1399   :  { %2211 = vmatpush3.bf16.msra.mxu1 %v2450_v13 }
0x139c   :  { %2085 = vmatmul.mubr.msk.f32.vlgmr.msra.gmra.mrb[14].mxu1 %vm38_vm3, %v1528_v6 }
0x1463   :  { %v1487_v42 = vpop.f32.mrb[12].mxu1 }
0x1464   :  { %v1488_v43 = vadd.f32 %v2522_v47, %v1487_v42  ;;  %v2071_v44 = vpop.f32.mrb[13].mxu1 }
0x1466   :  { %2333 = vtanh.f32 %v1488_v43  ;;  %v1491_v48 = vsub.f32 0.0, %v1488_v43 }
0x1468   :  { %v1492_v50 = vmul.f32 1.442695, %v1491_v48 }
0x146f   :  { %v1597_v45 = vpop.f32.mrb[14].mxu1 }
0x1470   :  { %v2334_v46 = vpop.eup %2333  ;;  %v1598_v3 = vadd.f32 %v2358_v8, %v1597_v45  ;;  %v2086_v11 = vpop.f32.mrb[15].mxu1 }
0x1471   :  { %1500 = vrot.lane.b32.xlu1 %v2334_v46, %s2386_s27 }
0x1472   :  { %2335 = vtanh.f32 %v1598_v3  ;;  %v1601_v51 = vsub.f32 0.0, %v1598_v3 }
0x1473   :  { %2337 = vpow2.f32 %v1492_v50 }
0x1474   :  { %v1602_v52 = vmul.f32 1.442695, %v1601_v51 }
0x1476   :  { %2339 = vpow2.f32 %v1602_v52 }
0x147c   :  { %v2336_v13 = vpop.eup %2335 }
0x147d   :  { %1610 = vrot.lane.b32.xlu0 %v2336_v13, %s2386_s27  ;;  %v2338_v12 = vpop.eup %2337 }
0x147e   :  { %v1494_v53 = vadd.f32 1.0, %v2338_v12 }
0x1480   :  { %2341 = vrcp.f32 %v1494_v53  ;;  %v2340_v54 = vpop.eup %2339 }
0x1481   :  { %v1604_v55 = vadd.f32 1.0, %v2340_v54 }
0x1483   :  { %2343 = vrcp.f32 %v1604_v55 }
0x148a   :  { %v2342_v56 = vpop.eup %2341 }
0x148b   :  { %v1498_v36 = vmul.f32 %v2342_v56, %v2739_v19 }
0x148d   :  { %v2344_v34 = vpop.eup %2343 }
0x148e   :  { %v1608_v0 = vmul.f32 %v2344_v34, %v2743_v24 }
0x14e3   :  { %v1501_v57 = vpop.permute.xlu1 %1500 }
0x14e4   :  { %v1503_v59 = vmul.f32 %v2342_v56, %v1501_v57 }
0x14e6   :  { %1505 = vrot.lane.b32.xlu1 %v1503_v59, %s2387_s28 }
0x14ef   :  { %v1611_v60 = vpop.permute.xlu0 %1610 }
0x14f0   :  { %v1613_v61 = vmul.f32 %v2344_v34, %v1611_v60 }
0x14f2   :  { %1615 = vrot.lane.b32.xlu0 %v1613_v61, %s2387_s28 }
0x1558   :  { %v1506_v62 = vpop.permute.xlu1 %1505 }
0x1559   :  { %v1508_v63 = vadd.f32 %v1506_v62, %v1498_v36 }
0x155b   :  { %2345 = vtanh.f32 %v1508_v63 }
0x1564   :  { %v1616_v1 = vpop.permute.xlu0 %1615 }
0x1565   :  { %v2346_v2 = vpop.eup %2345  ;;  %v1618_v5 = vadd.f32 %v1616_v1, %v1608_v0 }
0x1566   :  { %1511 = vrot.lane.b32.xlu1 %v2346_v2, %s2388_s9 }
0x1567   :  { %2347 = vtanh.f32 %v1618_v5 }
0x1571   :  { %v2348_v16 = vpop.eup %2347 }
0x1572   :  { %1621 = vrot.lane.b32.xlu0 %v2348_v16, %s2388_s9 }
0x15d8   :  { %v1512_v7 = vpop.permute.xlu1 %1511 }
0x15d9   :  { %v1514_v9 = vmul.f32 %v2342_v56, %v1512_v7 }
0x15db   :  { %1630 = vrot.lane.b32.xlu0 %v1514_v9, %s2386_s27 }
0x15e4   :  { %v1622_v10 = vpop.permute.xlu0 %1621 }
0x15e5   :  { %v1624_v14 = vmul.f32 %v2344_v34, %v1622_v10 }
0x15e7   :  { %1626 = vrot.lane.b32.xlu1 %v1624_v14, %s2389_s10 }
0x164d   :  { %v1631_v17 = vpop.permute.xlu0 %1630 }
0x1659   :  { %v1627_v18 = vpop.permute.xlu1 %1626 }
0x165a   :  { %v1633_v19 = vsel %vm140_vm4, %v1627_v18, %v1631_v17 }
0x165b   :  { %2096 = vmatmul.mubr.msk.f32.vlgmr.msra.gmra.mrb[14].mxu0 %vm32_vm2, %v1633_v19 }
0x172e   :  { %v1703_v20 = vpop.f32.mrb[14].mxu0 }
0x172f   :  { %v1704_v21 = vadd.f32 %v2522_v47, %v1703_v20  ;;  %v2097_v22 = vpop.f32.mrb[15].mxu0 }
0x1731   :  { %2349 = vtanh.f32 %v1704_v21  ;;  %v1707_v25 = vsub.f32 0.0, %v1704_v21 }
0x1733   :  { %v1708_v26 = vmul.f32 1.442695, %v1707_v25 }
0x1735   :  { %2351 = vpow2.f32 %v1708_v26 }
0x173b   :  { %v2350_v24 = vpop.eup %2349 }
0x173c   :  { %1716 = vrot.lane.b32.xlu1 %v2350_v24, %s2386_s27 }
0x173f   :  { %v2352_v28 = vpop.eup %2351 }
0x1740   :  { %v1710_v29 = vadd.f32 1.0, %v2352_v28 }
0x1742   :  { %2353 = vrcp.f32 %v1710_v29 }
0x174c   :  { %v2354_v30 = vpop.eup %2353 }
0x174d   :  { %v1714_v47 = vmul.f32 %v2354_v30, %v1508_v63 }
0x17ae   :  { %v1717_v31 = vpop.permute.xlu1 %1716 }
0x17af   :  { %v1719_v32 = vmul.f32 %v2354_v30, %v1717_v31 }
0x17b1   :  { %1721 = vrot.lane.b32.xlu0 %v1719_v32, %s2387_s28 }
0x17b5   :  { %1731 = vrot.lane.b32.xlu0 %v2539_v23, %s2389_s10 }
0x17b9   :  { %1737 = vrot.lane.b32.xlu0 %v2707_v40, %s2387_s28 }
0x17bd   :  { %1743 = vrot.lane.b32.xlu0 %v1514_v9, %s2391_s1 }
0x1823   :  { %v1722_v33 = vpop.permute.xlu0 %1721 }
0x1824   :  { %v1724_v35 = vadd.f32 %v1722_v33, %v1714_v47 }
0x1826   :  { %2355 = vtanh.f32 %v1724_v35 }
0x1827   :  { %v1732_v40 = vpop.permute.xlu0 %1731 }
0x1828   :  { %v1750_v4 = vsel %vm140_vm4, %v1732_v40, %v2584_v15 }
0x182b   :  { %v1738_v42 = vpop.permute.xlu0 %1737 }
0x182f   :  { %v1744_v44 = vpop.permute.xlu0 %1743 }
0x1830   :  { %v2356_v37 = vpop.eup %2355 }
0x1831   :  { %1727 = vrot.lane.b32.xlu1 %v2356_v37, %s2388_s9 }
0x1835   :  { %1734 = vrot.lane.b32.xlu1 %v2623_v58, %s2390_s11 }
0x1839   :  { %1740 = vrot.lane.b32.xlu1 %v2748_v27, %s2388_s9 }
0x18a3   :  { %v1728_v38 = vpop.permute.xlu1 %1727 }
0x18a4   :  { %v1730_v23 = vmul.f32 %v2354_v30, %v1728_v38 }
0x18a6   :  { %1747 = vrot.lane.b32.xlu1 %v1730_v23, %s2392_s17 }
0x18a7   :  { %v1735_v39 = vpop.permute.xlu1 %1734 }
0x18a8   :  { %v1751_v41 = vsel %vm32_vm2, %v1750_v4, %v1735_v39 }
0x18a9   :  { %v1752_v6 = vsel %vm38_vm3, %v1751_v41, %v2665_v49 }
0x18aa   :  { %v1754_v58 = vsel %vm1753_vm12, %v1752_v6, %v1738_v42 }
0x18ab   :  { %v1741_v43 = vpop.permute.xlu1 %1740 }
0x18ac   :  { %v1756_v27 = vsel %vm1755_vm13, %v1754_v58, %v1741_v43 }
0x18ad   :  { %v1758_v45 = vsel %vm1757_vm14, %v1756_v27, %v1744_v44 }
0x1918   :  { %v1748_v46 = vpop.permute.xlu1 %1747 }
0x1919   :  { %v1760_v15 = vsel %vm1759_vm15, %v1758_v45, %v1748_v46 }
0x191a   :  { %1761 = vst [vmem:[#allocation2] sm:$0x3] %v1760_v15 }
0x191b   :  { %2370 = shalt.err (!%p2367_p4)
}
0x191c   :  { %s2371_s23 = scalar_lea.hbm %s2817_s2, 32 }
0x191d   :  { %p2372_p5 = scmp.ne.s32.totalorder %s2817_s2, %s2371_s23  ;;  %p2375_p6 = scmp.lt.u32.totalorder %s2371_s23, %s2817_s2 }
0x191f   :  { %p2377_p7 = pnand %p2375_p6, %p2372_p5 }
0x1921   :  { %2380 = shalt.err (!%p2377_p7)
}
0x1922   :  { %1771 = dma.vmem_to_hbm [thread:$0]  %s1769_s19, 32, %s2817_s2, [#allocation3]  }
0x1923   :  { %2381 = dma.done.wait [#allocation3], 32  }
0x1924   :  { %2382 = vsyncadd [#allocation3], 4294967264 }
0x1925   :  { %1775 = vsyncpa [#allocation3], 1 }

</bundles_post_ra>
